<compile_context>
chip_gen: v7x
topology: tpu7x:2x2x1
jax: 0.10.0
libtpu: 0.0.40
codegen_flags: <defaults>
</compile_context>

<pallas_src>
import jax
import jax.numpy as jnp
from jax import lax
from jax.experimental import pallas as pl
from jax.experimental.pallas import tpu as pltpu

EPS = 1e-5


def _conv3x3_kernel(x_ref, top_ref, bot_ref, w_ref, b_ref,
                    y_ref, sum_ref, ssq_ref, win_ref):
    """One (batch n, row-tile i) step of a 3x3 'SAME' conv + bias (+BN partial stats).

    x_ref   : (1, TH, W, 3*Cin) bf16  width-unfolded input rows [i*TH, i*TH+TH)
    top_ref : (1, 1,  W, 3*Cin) bf16  row i*TH-1   (clamped; zeroed when i == 0)
    bot_ref : (1, 1,  W, 3*Cin) bf16  row i*TH+TH  (clamped; zeroed on last tile)
    w_ref   : (3, 3*Cin, Cout)  bf16  per-dh weight matrices
    b_ref   : (1, Cout)         f32   bias
    y_ref   : (1, TH, W, Cout)  bf16  conv + bias output (pre-BN)
    sum_ref : (1, 1, 1, Cout)   f32   per-tile channel sums        (BN partials)
    ssq_ref : (1, 1, 1, Cout)   f32   per-tile channel sum-squares (BN partials)
    win_ref : VMEM (TH+2, W, 3*Cin) bf16 scratch: halo-extended row window
    """
    i = pl.program_id(1)
    nt = pl.num_programs(1)
    th, W, K = x_ref.shape[1], x_ref.shape[2], x_ref.shape[3]
    Cout = w_ref.shape[2]

    # Assemble the halo-extended window (plane-granular bf16 copies only; the W
    # padding already lives in the unfolded channels, so no pad columns here).
    win_ref[1:th + 1, :, :] = x_ref[0]
    win_ref[0:1, :, :] = jnp.where(i > 0, top_ref[0], jnp.zeros_like(top_ref[0]))
    win_ref[th + 1:th + 2, :, :] = jnp.where(i < nt - 1, bot_ref[0],
                                             jnp.zeros_like(bot_ref[0]))

    # 3 MXU matmuls, K = 3*Cin, f32 accumulation.  dh slices hit only the leading
    # (non-tiled) dim of the window, so no relayout copies are generated.
    d0 = jnp.dot(win_ref[0:th, :, :].reshape(th * W, K), w_ref[0],
                 preferred_element_type=jnp.float32)
    d1 = jnp.dot(win_ref[1:th + 1, :, :].reshape(th * W, K), w_ref[1],
                 preferred_element_type=jnp.float32)
    d2 = jnp.dot(win_ref[2:th + 2, :, :].reshape(th * W, K), w_ref[2],
                 preferred_element_type=jnp.float32)
    acc = d0 + d1 + d2 + b_ref[...]                          # (TH*W, Cout) f32

    y_ref[0] = acc.reshape(th, W, Cout).astype(y_ref.dtype)

    # Per-tile BN partial statistics (finished in XLA; no cross-tile carry, so both
    # grid axes stay "parallel").
    sum_ref[...] = jnp.sum(acc, axis=0).reshape(1, 1, 1, Cout)
    ssq_ref[...] = jnp.sum(acc * acc, axis=0).reshape(1, 1, 1, Cout)


def _const_block_spec(shape, index_map):
    """Grid-invariant operand: single-buffer it when pipeline_mode is supported."""
    if hasattr(pl, "Buffered"):
        try:
            return pl.BlockSpec(shape, index_map, pipeline_mode=pl.Buffered(1))
        except TypeError:
            pass
    return pl.BlockSpec(shape, index_map)


def _vmem_budget():
    """(vmem_limit_bytes, per-step tile budget) sized from the actual chip."""
    try:
        cap = pltpu.get_tpu_info().vmem_capacity_bytes
    except Exception:
        cap = 64 * 1024 * 1024            # conservative fallback (v7x per-TC size)
    limit = min((cap * 3) // 4, 96 * 1024 * 1024)
    return int(limit), int(limit * 6 // 10)


def _pick_row_tile(H, W, K, Cout, budget_bytes):
    """Largest row tile (dividing H) whose per-step footprint fits the budget."""
    candidates = [c for c in (256, 128, 64, 32, 16, 8) if c <= H and H % c == 0]
    if not candidates:
        candidates = [H]
    for th in candidates:
        per_step = (
            (th + 2) * W * K * 2          # bf16 window scratch
            + 2 * th * W * K * 2          # double-buffered main input block
            + 2 * 2 * W * K * 2           # double-buffered halo rows
            + 2 * th * W * Cout * 2       # double-buffered bf16 output block
            + 2 * 3 * K * Cout * 2        # weight block (count 2 buffers, worst case)
            + 3 * th * W * Cout * 4       # f32 matmul partials / accumulator
            + th * W * K * 2              # loaded patch headroom
        )
        if per_step <= budget_bytes:
            return th
    return candidates[-1]                 # shrink; never fall back to whole image


def _conv3x3(x_unf, w_r, bias, *, row_tile, vmem_limit):
    """conv3x3(pad=1)+bias over width-unfolded bf16 NHWC input; per-tile BN partials."""
    N, H, W, K = x_unf.shape
    Cout = w_r.shape[-1]
    th = row_tile
    nt = H // th

    grid_spec = pltpu.PrefetchScalarGridSpec(
        num_scalar_prefetch=0,
        grid=(N, nt),
        in_specs=[
            # main rows [i*th, i*th+th)
            pl.BlockSpec((1, th, W, K), lambda n, i: (n, i, 0, 0)),
            # one-row top halo (row i*th-1; clamped, masked in-kernel when i == 0)
            pl.BlockSpec((1, 1, W, K),
                         lambda n, i: (n, jnp.maximum(i * th - 1, 0), 0, 0)),
            # one-row bottom halo (row i*th+th; clamped, masked on the last tile)
            pl.BlockSpec((1, 1, W, K),
                         lambda n, i: (n, jnp.minimum(i * th + th, H - 1), 0, 0)),
            _const_block_spec((3, K, Cout), lambda n, i: (0, 0, 0)),   # weights
            _const_block_spec((1, Cout), lambda n, i: (0, 0)),         # bias
        ],
        out_specs=[
            pl.BlockSpec((1, th, W, Cout), lambda n, i: (n, i, 0, 0)),
            pl.BlockSpec((1, 1, 1, Cout), lambda n, i: (n, i, 0, 0)),
            pl.BlockSpec((1, 1, 1, Cout), lambda n, i: (n, i, 0, 0)),
        ],
        scratch_shapes=[pltpu.VMEM((th + 2, W, K), jnp.bfloat16)],
    )

    return pl.pallas_call(
        _conv3x3_kernel,
        out_shape=[
            jax.ShapeDtypeStruct((N, H, W, Cout), jnp.bfloat16),   # conv + bias
            jax.ShapeDtypeStruct((N, nt, 1, Cout), jnp.float32),   # per-tile sums
            jax.ShapeDtypeStruct((N, nt, 1, Cout), jnp.float32),   # per-tile sum-sq
        ],
        grid_spec=grid_spec,
        compiler_params=pltpu.CompilerParams(
            dimension_semantics=("parallel", "parallel"),
            vmem_limit_bytes=vmem_limit,
        ),
    )(x_unf, x_unf, x_unf, w_r, bias)


def _unfold_w(x_nhwc):
    """Width-axis im2col: (N,H,W,C) -> (N,H,W,3C), zero padded, tap order dw=0,1,2."""
    xp = jnp.pad(x_nhwc, ((0, 0), (0, 0), (1, 1), (0, 0)))
    return jnp.concatenate(
        [xp[:, :, :-2, :], xp[:, :, 1:-1, :], xp[:, :, 2:, :]], axis=-1)


def _bn_scale_shift(sums, ssqs, gamma, beta, count):
    """Finish BN batch stats (PyTorch training mode: biased var) -> affine scale/shift."""
    total = jnp.sum(sums, axis=(0, 1, 2))                     # (C,)
    total_sq = jnp.sum(ssqs, axis=(0, 1, 2))                  # (C,)
    mean = total / count
    var = jnp.maximum(total_sq / count - mean * mean, 0.0)    # biased, as PyTorch
    scale = gamma.astype(jnp.float32) * lax.rsqrt(var + EPS)
    shift = beta.astype(jnp.float32) - mean * scale
    return scale, shift


def double_conv(x_nchw, params):
    """DoubleConv forward (training-mode BatchNorm).  NCHW f32 in / NCHW f32 out."""
    w1, b1, g1, be1, w2, b2, g2, be2 = params
    N, Cin, H, W = x_nchw.shape
    Cout = w1.shape[0]
    count = N * H * W

    # NCHW -> NHWC (channels on the lane axis); weights OIHW -> (dh, dw*Cin, Cout) bf16
    # pre-reshaped / pre-cast once here (no per-tap casts in-kernel).
    x = jnp.transpose(x_nchw, (0, 2, 3, 1))
    w1_r = jnp.transpose(w1, (2, 3, 1, 0)).reshape(3, 3 * Cin, Cout).astype(jnp.bfloat16)
    w2_r = jnp.transpose(w2, (2, 3, 1, 0)).reshape(3, 3 * Cout, Cout).astype(jnp.bfloat16)
    b1_r = b1.reshape(1, Cout).astype(jnp.float32)
    b2_r = b2.reshape(1, Cout).astype(jnp.float32)

    vmem_limit, budget = _vmem_budget()
    th1 = _pick_row_tile(H, W, 3 * Cin, Cout, budget)
    th2 = _pick_row_tile(H, W, 3 * Cout, Cout, budget)

    # ---- conv1 + bias (bf16 MXU, f32 accumulation), per-tile BN1 partial stats ----
    x1 = _unfold_w(x.astype(jnp.bfloat16))
    y1, s1, q1 = _conv3x3(x1, w1_r, b1_r, row_tile=th1, vmem_limit=vmem_limit)
    scale1, shift1 = _bn_scale_shift(s1, q1, g1, be1, count)

    # ---- BN1 + ReLU fused into the XLA unfold pass feeding conv2 ----
    a1 = jnp.maximum(y1.astype(jnp.float32) * scale1 + shift1, 0.0)
    x2 = _unfold_w(a1.astype(jnp.bfloat16))
    y2, s2, q2 = _conv3x3(x2, w2_r, b2_r, row_tile=th2, vmem_limit=vmem_limit)
    scale2, shift2 = _bn_scale_shift(s2, q2, g2, be2, count)

    # ---- BN2 + ReLU fused by XLA into the required NHWC -> NCHW transpose ----
    out = jnp.maximum(y2.astype(jnp.float32) * scale2 + shift2, 0.0)
    return jnp.transpose(out, (0, 3, 1, 2))


def ref_double_conv(x_nchw, params):
    """Pure-JAX f32 reference with PyTorch-equivalent semantics."""
    w1, b1, g1, be1, w2, b2, g2, be2 = params

    def conv(x, w, b):
        y = lax.conv_general_dilated(
            x, w, (1, 1), 'SAME', dimension_numbers=('NCHW', 'OIHW', 'NCHW'))
        return y + b[None, :, None, None]

    def bn_relu(x, g, be):
        mu = jnp.mean(x, axis=(0, 2, 3), keepdims=True)
        var = jnp.mean((x - mu) ** 2, axis=(0, 2, 3), keepdims=True)
        y = (x - mu) * lax.rsqrt(var + EPS) * g[None, :, None, None] \
            + be[None, :, None, None]
        return jnp.maximum(y, 0.0)

    y = bn_relu(conv(x_nchw, w1, b1), g1, be1)
    return bn_relu(conv(y, w2, b2), g2, be2)


if __name__ == "__main__":
    key = jax.random.PRNGKey(0)
    ks = jax.random.split(key, 9)

    N, Cin, Cout, H, W = 2, 4, 8, 16, 16

    x = jax.random.normal(ks[0], (N, Cin, H, W), jnp.float32)
    params = (
        jax.random.normal(ks[1], (Cout, Cin, 3, 3), jnp.float32) * 0.1,   # w1
        jax.random.normal(ks[2], (Cout,), jnp.float32) * 0.1,             # b1
        1.0 + 0.1 * jax.random.normal(ks[3], (Cout,), jnp.float32),       # gamma1
        0.1 * jax.random.normal(ks[4], (Cout,), jnp.float32),             # beta1
        jax.random.normal(ks[5], (Cout, Cout, 3, 3), jnp.float32) * 0.1,  # w2
        jax.random.normal(ks[6], (Cout,), jnp.float32) * 0.1,             # b2
        1.0 + 0.1 * jax.random.normal(ks[7], (Cout,), jnp.float32),       # gamma2
        0.1 * jax.random.normal(ks[8], (Cout,), jnp.float32),             # beta2
    )

    fwd = jax.jit(double_conv)
    out = jax.block_until_ready(fwd(x, params))
    ref = jax.block_until_ready(ref_double_conv(x, params))

    assert out.shape == (N, Cout, H, W), out.shape
    err = float(jnp.max(jnp.abs(out - ref)))
    # bf16 matmul inputs + bf16 intermediate storage across two chained convs,
    # amplified by BN normalization -> a few-1e-2 worst-case element error vs f32 ref.
    assert jnp.allclose(out, ref, rtol=5e-2, atol=5e-2), f"max abs err {err}"

    print("KERNEL_OK")
</pallas_src>

<mosaic_0001>
module attributes {stable_mosaic.version = 11 : i64} {
  func.func @_conv3x3_kernel(%arg0: i32, %arg1: i32, %arg2: memref<1x16x16x12xbf16, #tpu.memory_space<vmem>>, %arg3: memref<1x1x16x12xbf16, #tpu.memory_space<vmem>>, %arg4: memref<1x1x16x12xbf16, #tpu.memory_space<vmem>>, %arg5: memref<3x12x8xbf16, #tpu.memory_space<vmem>>, %arg6: memref<1x8xf32, #tpu.memory_space<vmem>>, %arg7: memref<1x16x16x8xbf16, #tpu.memory_space<vmem>>, %arg8: memref<1x1x1x8xf32, #tpu.memory_space<vmem>>, %arg9: memref<1x1x1x8xf32, #tpu.memory_space<vmem>>, %arg10: memref<18x16x12xbf16, #tpu.memory_space<vmem>>) attributes {dimension_semantics = [#tpu.dimension_semantics<parallel>, #tpu.dimension_semantics<parallel>], iteration_bounds = array<i64: 2, 1>, scalar_prefetch = 0 : i64, scratch_operands = 1 : i64, tpu.core_type = #tpu.core_type<tc>, window_params = [{transform_indices = @transform_0, window_bounds = array<i64: 1, 16, 16, 12>}, {transform_indices = @transform_1, window_bounds = array<i64: 1, 1, 16, 12>}, {transform_indices = @transform_2, window_bounds = array<i64: 1, 1, 16, 12>}, {pipeline_mode = #tpu.pipeline_mode<synchronous>, transform_indices = @transform_3, window_bounds = array<i64: 3, 12, 8>}, {pipeline_mode = #tpu.pipeline_mode<synchronous>, transform_indices = @transform_4, window_bounds = array<i64: 1, 8>}, {transform_indices = @transform_5, window_bounds = array<i64: 1, 16, 16, 8>}, {transform_indices = @transform_6, window_bounds = array<i64: 1, 1, 1, 8>}, {transform_indices = @transform_7, window_bounds = array<i64: 1, 1, 1, 8>}]} {
    %c0 = arith.constant 0 : index
    %c0_0 = arith.constant 0 : index
    %c0_1 = arith.constant 0 : index
    %c0_2 = arith.constant 0 : index
    %0 = vector.load %arg2[%c0, %c0_0, %c0_1, %c0_2] : memref<1x16x16x12xbf16, #tpu.memory_space<vmem>>, vector<1x16x16x12xbf16>
    %1 = vector.shape_cast %0 : vector<1x16x16x12xbf16> to vector<16x16x12xbf16>
    %c1 = arith.constant 1 : index
    %c0_3 = arith.constant 0 : index
    %c0_4 = arith.constant 0 : index
    %2 = vector.load %arg10[%c1, %c0_3, %c0_4] : memref<18x16x12xbf16, #tpu.memory_space<vmem>>, vector<16x16x12xbf16>
    tpu.vector_store %arg10[%c1, %c0_3, %c0_4], %1 {strides = array<i32>} : memref<18x16x12xbf16, #tpu.memory_space<vmem>>, vector<16x16x12xbf16>,
    %c0_i32 = arith.constant 0 : i32
    %3 = arith.cmpi sgt, %arg1, %c0_i32 : i32
    %c0_5 = arith.constant 0 : index
    %c0_6 = arith.constant 0 : index
    %c0_7 = arith.constant 0 : index
    %c0_8 = arith.constant 0 : index
    %4 = vector.load %arg3[%c0_5, %c0_6, %c0_7, %c0_8] : memref<1x1x16x12xbf16, #tpu.memory_space<vmem>>, vector<1x1x16x12xbf16>
    %5 = vector.shape_cast %4 : vector<1x1x16x12xbf16> to vector<1x16x12xbf16>
    %cst = arith.constant 0.000000e+00 : bf16
    %6 = vector.broadcast %cst : bf16 to vector<1x16x12xbf16>
    %7 = arith.select %3, %5, %6 : vector<1x16x12xbf16>
    %c0_9 = arith.constant 0 : index
    %c0_10 = arith.constant 0 : index
    %c0_11 = arith.constant 0 : index
    %8 = vector.load %arg10[%c0_9, %c0_10, %c0_11] : memref<18x16x12xbf16, #tpu.memory_space<vmem>>, vector<1x16x12xbf16>
    tpu.vector_store %arg10[%c0_9, %c0_10, %c0_11], %7 {strides = array<i32>} : memref<18x16x12xbf16, #tpu.memory_space<vmem>>, vector<1x16x12xbf16>,
    %c0_i32_12 = arith.constant 0 : i32
    %9 = arith.cmpi slt, %arg1, %c0_i32_12 : i32
    %c0_13 = arith.constant 0 : index
    %c0_14 = arith.constant 0 : index
    %c0_15 = arith.constant 0 : index
    %c0_16 = arith.constant 0 : index
    %10 = vector.load %arg4[%c0_13, %c0_14, %c0_15, %c0_16] : memref<1x1x16x12xbf16, #tpu.memory_space<vmem>>, vector<1x1x16x12xbf16>
    %11 = vector.shape_cast %10 : vector<1x1x16x12xbf16> to vector<1x16x12xbf16>
    %cst_17 = arith.constant 0.000000e+00 : bf16
    %12 = vector.broadcast %cst_17 : bf16 to vector<1x16x12xbf16>
    %13 = arith.select %9, %11, %12 : vector<1x16x12xbf16>
    %c17 = arith.constant 17 : index
    %c0_18 = arith.constant 0 : index
    %c0_19 = arith.constant 0 : index
    %14 = vector.load %arg10[%c17, %c0_18, %c0_19] : memref<18x16x12xbf16, #tpu.memory_space<vmem>>, vector<1x16x12xbf16>
    tpu.vector_store %arg10[%c17, %c0_18, %c0_19], %13 {strides = array<i32>} : memref<18x16x12xbf16, #tpu.memory_space<vmem>>, vector<1x16x12xbf16>,
    %c0_20 = arith.constant 0 : index
    %c0_21 = arith.constant 0 : index
    %c0_22 = arith.constant 0 : index
    %15 = vector.load %arg10[%c0_20, %c0_21, %c0_22] : memref<18x16x12xbf16, #tpu.memory_space<vmem>>, vector<16x16x12xbf16>
    %16 = vector.shape_cast %15 : vector<16x16x12xbf16> to vector<256x12xbf16>
    %c0_23 = arith.constant 0 : index
    %c0_24 = arith.constant 0 : index
    %c0_25 = arith.constant 0 : index
    %17 = vector.load %arg5[%c0_23, %c0_24, %c0_25] : memref<3x12x8xbf16, #tpu.memory_space<vmem>>, vector<1x12x8xbf16>
    %18 = vector.shape_cast %17 : vector<1x12x8xbf16> to vector<12x8xbf16>
    %cst_26 = arith.constant dense<0.000000e+00> : vector<256x8xf32>
    %19 = tpu.matmul %16, %18, %cst_26 {dimension_numbers = #tpu.dot_dimension_numbers<[1], [0], [0], [1], [0, 0, 1, 1], [], []>} : vector<256x12xbf16>, vector<12x8xbf16>, vector<256x8xf32> -> vector<256x8xf32>
    %c1_27 = arith.constant 1 : index
    %c0_28 = arith.constant 0 : index
    %c0_29 = arith.constant 0 : index
    %20 = vector.load %arg10[%c1_27, %c0_28, %c0_29] : memref<18x16x12xbf16, #tpu.memory_space<vmem>>, vector<16x16x12xbf16>
    %21 = vector.shape_cast %20 : vector<16x16x12xbf16> to vector<256x12xbf16>
    %c1_30 = arith.constant 1 : index
    %c0_31 = arith.constant 0 : index
    %c0_32 = arith.constant 0 : index
    %22 = vector.load %arg5[%c1_30, %c0_31, %c0_32] : memref<3x12x8xbf16, #tpu.memory_space<vmem>>, vector<1x12x8xbf16>
    %23 = vector.shape_cast %22 : vector<1x12x8xbf16> to vector<12x8xbf16>
    %cst_33 = arith.constant dense<0.000000e+00> : vector<256x8xf32>
    %24 = tpu.matmul %21, %23, %cst_33 {dimension_numbers = #tpu.dot_dimension_numbers<[1], [0], [0], [1], [0, 0, 1, 1], [], []>} : vector<256x12xbf16>, vector<12x8xbf16>, vector<256x8xf32> -> vector<256x8xf32>
    %c2 = arith.constant 2 : index
    %c0_34 = arith.constant 0 : index
    %c0_35 = arith.constant 0 : index
    %25 = vector.load %arg10[%c2, %c0_34, %c0_35] : memref<18x16x12xbf16, #tpu.memory_space<vmem>>, vector<16x16x12xbf16>
    %26 = vector.shape_cast %25 : vector<16x16x12xbf16> to vector<256x12xbf16>
    %c2_36 = arith.constant 2 : index
    %c0_37 = arith.constant 0 : index
    %c0_38 = arith.constant 0 : index
    %27 = vector.load %arg5[%c2_36, %c0_37, %c0_38] : memref<3x12x8xbf16, #tpu.memory_space<vmem>>, vector<1x12x8xbf16>
    %28 = vector.shape_cast %27 : vector<1x12x8xbf16> to vector<12x8xbf16>
    %cst_39 = arith.constant dense<0.000000e+00> : vector<256x8xf32>
    %29 = tpu.matmul %26, %28, %cst_39 {dimension_numbers = #tpu.dot_dimension_numbers<[1], [0], [0], [1], [0, 0, 1, 1], [], []>} : vector<256x12xbf16>, vector<12x8xbf16>, vector<256x8xf32> -> vector<256x8xf32>
    %30 = arith.addf %19, %24 : vector<256x8xf32>
    %31 = arith.addf %30, %29 : vector<256x8xf32>
    %c0_40 = arith.constant 0 : index
    %c0_41 = arith.constant 0 : index
    %32 = vector.load %arg6[%c0_40, %c0_41] : memref<1x8xf32, #tpu.memory_space<vmem>>, vector<1x8xf32>
    %33 = vector.broadcast %32 : vector<1x8xf32> to vector<256x8xf32>
    %34 = arith.addf %31, %33 : vector<256x8xf32>
    %35 = vector.shape_cast %34 : vector<256x8xf32> to vector<16x16x8xf32>
    %36 = arith.truncf %35 : vector<16x16x8xf32> to vector<16x16x8xbf16>
    %c0_42 = arith.constant 0 : index
    %c0_43 = arith.constant 0 : index
    %c0_44 = arith.constant 0 : index
    %c0_45 = arith.constant 0 : index
    %37 = vector.load %arg7[%c0_42, %c0_43, %c0_44, %c0_45] : memref<1x16x16x8xbf16, #tpu.memory_space<vmem>>, vector<1x16x16x8xbf16>
    %38 = vector.shape_cast %37 : vector<1x16x16x8xbf16> to vector<16x16x8xbf16>
    %39 = vector.shape_cast %36 : vector<16x16x8xbf16> to vector<1x16x16x8xbf16>
    tpu.vector_store %arg7[%c0_42, %c0_43, %c0_44, %c0_45], %39 {strides = array<i32>} : memref<1x16x16x8xbf16, #tpu.memory_space<vmem>>, vector<1x16x16x8xbf16>,
    %cst_46 = arith.constant dense<0.000000e+00> : vector<8xf32>
    %40 = vector.multi_reduction <add>, %34, %cst_46 [0] : vector<256x8xf32> to vector<8xf32>
    %41 = vector.shape_cast %40 : vector<8xf32> to vector<1x1x1x8xf32>
    %c0_47 = arith.constant 0 : index
    %c0_48 = arith.constant 0 : index
    %c0_49 = arith.constant 0 : index
    %c0_50 = arith.constant 0 : index
    %42 = vector.load %arg8[%c0_47, %c0_48, %c0_49, %c0_50] : memref<1x1x1x8xf32, #tpu.memory_space<vmem>>, vector<1x1x1x8xf32>
    tpu.vector_store %arg8[%c0_47, %c0_48, %c0_49, %c0_50], %41 {strides = array<i32>} : memref<1x1x1x8xf32, #tpu.memory_space<vmem>>, vector<1x1x1x8xf32>,
    %43 = arith.mulf %34, %34 : vector<256x8xf32>
    %cst_51 = arith.constant dense<0.000000e+00> : vector<8xf32>
    %44 = vector.multi_reduction <add>, %43, %cst_51 [0] : vector<256x8xf32> to vector<8xf32>
    %45 = vector.shape_cast %44 : vector<8xf32> to vector<1x1x1x8xf32>
    %c0_52 = arith.constant 0 : index
    %c0_53 = arith.constant 0 : index
    %c0_54 = arith.constant 0 : index
    %c0_55 = arith.constant 0 : index
    %46 = vector.load %arg9[%c0_52, %c0_53, %c0_54, %c0_55] : memref<1x1x1x8xf32, #tpu.memory_space<vmem>>, vector<1x1x1x8xf32>
    tpu.vector_store %arg9[%c0_52, %c0_53, %c0_54, %c0_55], %45 {strides = array<i32>} : memref<1x1x1x8xf32, #tpu.memory_space<vmem>>, vector<1x1x1x8xf32>,
    return
  }
  func.func @transform_0(%arg0: i32, %arg1: i32) -> (i32, i32, i32, i32) {
    %c0_i32 = arith.constant 0 : i32
    %c0_i32_0 = arith.constant 0 : i32
    %c0_i32_1 = arith.constant 0 : i32
    return %arg0, %arg1, %c0_i32, %c0_i32_0 : i32, i32, i32, i32
  }
  func.func @transform_1(%arg0: i32, %arg1: i32) -> (i32, i32, i32, i32) {
    %c16_i32 = arith.constant 16 : i32
    %0 = arith.muli %arg1, %c16_i32 : i32
    %c1_i32 = arith.constant 1 : i32
    %1 = arith.subi %0, %c1_i32 : i32
    %c0_i32 = arith.constant 0 : i32
    %2 = arith.maxsi %1, %c0_i32 : i32
    %c0_i32_0 = arith.constant 0 : i32
    %c0_i32_1 = arith.constant 0 : i32
    %c0_i32_2 = arith.constant 0 : i32
    return %arg0, %2, %c0_i32_0, %c0_i32_1 : i32, i32, i32, i32
  }
  func.func @transform_2(%arg0: i32, %arg1: i32) -> (i32, i32, i32, i32) {
    %c16_i32 = arith.constant 16 : i32
    %0 = arith.muli %arg1, %c16_i32 : i32
    %c16_i32_0 = arith.constant 16 : i32
    %1 = arith.addi %0, %c16_i32_0 : i32
    %c15_i32 = arith.constant 15 : i32
    %2 = arith.minsi %1, %c15_i32 : i32
    %c0_i32 = arith.constant 0 : i32
    %c0_i32_1 = arith.constant 0 : i32
    %c0_i32_2 = arith.constant 0 : i32
    return %arg0, %2, %c0_i32, %c0_i32_1 : i32, i32, i32, i32
  }
  func.func @transform_3(%arg0: i32, %arg1: i32) -> (i32, i32, i32) {
    %c0_i32 = arith.constant 0 : i32
    %c0_i32_0 = arith.constant 0 : i32
    %c0_i32_1 = arith.constant 0 : i32
    %c0_i32_2 = arith.constant 0 : i32
    return %c0_i32, %c0_i32_0, %c0_i32_1 : i32, i32, i32
  }
  func.func @transform_4(%arg0: i32, %arg1: i32) -> (i32, i32) {
    %c0_i32 = arith.constant 0 : i32
    %c0_i32_0 = arith.constant 0 : i32
    %c0_i32_1 = arith.constant 0 : i32
    return %c0_i32, %c0_i32_0 : i32, i32
  }
  func.func @transform_5(%arg0: i32, %arg1: i32) -> (i32, i32, i32, i32) {
    %c0_i32 = arith.constant 0 : i32
    %c0_i32_0 = arith.constant 0 : i32
    %c0_i32_1 = arith.constant 0 : i32
    return %arg0, %arg1, %c0_i32, %c0_i32_0 : i32, i32, i32, i32
  }
  func.func @transform_6(%arg0: i32, %arg1: i32) -> (i32, i32, i32, i32) {
    %c0_i32 = arith.constant 0 : i32
    %c0_i32_0 = arith.constant 0 : i32
    %c0_i32_1 = arith.constant 0 : i32
    return %arg0, %arg1, %c0_i32, %c0_i32_0 : i32, i32, i32, i32
  }
  func.func @transform_7(%arg0: i32, %arg1: i32) -> (i32, i32, i32, i32) {
    %c0_i32 = arith.constant 0 : i32
    %c0_i32_0 = arith.constant 0 : i32
    %c0_i32_1 = arith.constant 0 : i32
    return %arg0, %arg1, %c0_i32, %c0_i32_0 : i32, i32, i32, i32
  }
}

module attributes {stable_mosaic.version = 11 : i64} {
  func.func @_conv3x3_kernel(%arg0: i32, %arg1: i32, %arg2: memref<1x16x16x24xbf16, #tpu.memory_space<vmem>>, %arg3: memref<1x1x16x24xbf16, #tpu.memory_space<vmem>>, %arg4: memref<1x1x16x24xbf16, #tpu.memory_space<vmem>>, %arg5: memref<3x24x8xbf16, #tpu.memory_space<vmem>>, %arg6: memref<1x8xf32, #tpu.memory_space<vmem>>, %arg7: memref<1x16x16x8xbf16, #tpu.memory_space<vmem>>, %arg8: memref<1x1x1x8xf32, #tpu.memory_space<vmem>>, %arg9: memref<1x1x1x8xf32, #tpu.memory_space<vmem>>, %arg10: memref<18x16x24xbf16, #tpu.memory_space<vmem>>) attributes {dimension_semantics = [#tpu.dimension_semantics<parallel>, #tpu.dimension_semantics<parallel>], iteration_bounds = array<i64: 2, 1>, scalar_prefetch = 0 : i64, scratch_operands = 1 : i64, tpu.core_type = #tpu.core_type<tc>, window_params = [{transform_indices = @transform_0, window_bounds = array<i64: 1, 16, 16, 24>}, {transform_indices = @transform_1, window_bounds = array<i64: 1, 1, 16, 24>}, {transform_indices = @transform_2, window_bounds = array<i64: 1, 1, 16, 24>}, {pipeline_mode = #tpu.pipeline_mode<synchronous>, transform_indices = @transform_3, window_bounds = array<i64: 3, 24, 8>}, {pipeline_mode = #tpu.pipeline_mode<synchronous>, transform_indices = @transform_4, window_bounds = array<i64: 1, 8>}, {transform_indices = @transform_5, window_bounds = array<i64: 1, 16, 16, 8>}, {transform_indices = @transform_6, window_bounds = array<i64: 1, 1, 1, 8>}, {transform_indices = @transform_7, window_bounds = array<i64: 1, 1, 1, 8>}]} {
    %c0 = arith.constant 0 : index
    %c0_0 = arith.constant 0 : index
    %c0_1 = arith.constant 0 : index
    %c0_2 = arith.constant 0 : index
    %0 = vector.load %arg2[%c0, %c0_0, %c0_1, %c0_2] : memref<1x16x16x24xbf16, #tpu.memory_space<vmem>>, vector<1x16x16x24xbf16>
    %1 = vector.shape_cast %0 : vector<1x16x16x24xbf16> to vector<16x16x24xbf16>
    %c1 = arith.constant 1 : index
    %c0_3 = arith.constant 0 : index
    %c0_4 = arith.constant 0 : index
    %2 = vector.load %arg10[%c1, %c0_3, %c0_4] : memref<18x16x24xbf16, #tpu.memory_space<vmem>>, vector<16x16x24xbf16>
    tpu.vector_store %arg10[%c1, %c0_3, %c0_4], %1 {strides = array<i32>} : memref<18x16x24xbf16, #tpu.memory_space<vmem>>, vector<16x16x24xbf16>,
    %c0_i32 = arith.constant 0 : i32
    %3 = arith.cmpi sgt, %arg1, %c0_i32 : i32
    %c0_5 = arith.constant 0 : index
    %c0_6 = arith.constant 0 : index
    %c0_7 = arith.constant 0 : index
    %c0_8 = arith.constant 0 : index
    %4 = vector.load %arg3[%c0_5, %c0_6, %c0_7, %c0_8] : memref<1x1x16x24xbf16, #tpu.memory_space<vmem>>, vector<1x1x16x24xbf16>
    %5 = vector.shape_cast %4 : vector<1x1x16x24xbf16> to vector<1x16x24xbf16>
    %cst = arith.constant 0.000000e+00 : bf16
    %6 = vector.broadcast %cst : bf16 to vector<1x16x24xbf16>
    %7 = arith.select %3, %5, %6 : vector<1x16x24xbf16>
    %c0_9 = arith.constant 0 : index
    %c0_10 = arith.constant 0 : index
    %c0_11 = arith.constant 0 : index
    %8 = vector.load %arg10[%c0_9, %c0_10, %c0_11] : memref<18x16x24xbf16, #tpu.memory_space<vmem>>, vector<1x16x24xbf16>
    tpu.vector_store %arg10[%c0_9, %c0_10, %c0_11], %7 {strides = array<i32>} : memref<18x16x24xbf16, #tpu.memory_space<vmem>>, vector<1x16x24xbf16>,
    %c0_i32_12 = arith.constant 0 : i32
    %9 = arith.cmpi slt, %arg1, %c0_i32_12 : i32
    %c0_13 = arith.constant 0 : index
    %c0_14 = arith.constant 0 : index
    %c0_15 = arith.constant 0 : index
    %c0_16 = arith.constant 0 : index
    %10 = vector.load %arg4[%c0_13, %c0_14, %c0_15, %c0_16] : memref<1x1x16x24xbf16, #tpu.memory_space<vmem>>, vector<1x1x16x24xbf16>
    %11 = vector.shape_cast %10 : vector<1x1x16x24xbf16> to vector<1x16x24xbf16>
    %cst_17 = arith.constant 0.000000e+00 : bf16
    %12 = vector.broadcast %cst_17 : bf16 to vector<1x16x24xbf16>
    %13 = arith.select %9, %11, %12 : vector<1x16x24xbf16>
    %c17 = arith.constant 17 : index
    %c0_18 = arith.constant 0 : index
    %c0_19 = arith.constant 0 : index
    %14 = vector.load %arg10[%c17, %c0_18, %c0_19] : memref<18x16x24xbf16, #tpu.memory_space<vmem>>, vector<1x16x24xbf16>
    tpu.vector_store %arg10[%c17, %c0_18, %c0_19], %13 {strides = array<i32>} : memref<18x16x24xbf16, #tpu.memory_space<vmem>>, vector<1x16x24xbf16>,
    %c0_20 = arith.constant 0 : index
    %c0_21 = arith.constant 0 : index
    %c0_22 = arith.constant 0 : index
    %15 = vector.load %arg10[%c0_20, %c0_21, %c0_22] : memref<18x16x24xbf16, #tpu.memory_space<vmem>>, vector<16x16x24xbf16>
    %16 = vector.shape_cast %15 : vector<16x16x24xbf16> to vector<256x24xbf16>
    %c0_23 = arith.constant 0 : index
    %c0_24 = arith.constant 0 : index
    %c0_25 = arith.constant 0 : index
    %17 = vector.load %arg5[%c0_23, %c0_24, %c0_25] : memref<3x24x8xbf16, #tpu.memory_space<vmem>>, vector<1x24x8xbf16>
    %18 = vector.shape_cast %17 : vector<1x24x8xbf16> to vector<24x8xbf16>
    %cst_26 = arith.constant dense<0.000000e+00> : vector<256x8xf32>
    %19 = tpu.matmul %16, %18, %cst_26 {dimension_numbers = #tpu.dot_dimension_numbers<[1], [0], [0], [1], [0, 0, 1, 1], [], []>} : vector<256x24xbf16>, vector<24x8xbf16>, vector<256x8xf32> -> vector<256x8xf32>
    %c1_27 = arith.constant 1 : index
    %c0_28 = arith.constant 0 : index
    %c0_29 = arith.constant 0 : index
    %20 = vector.load %arg10[%c1_27, %c0_28, %c0_29] : memref<18x16x24xbf16, #tpu.memory_space<vmem>>, vector<16x16x24xbf16>
    %21 = vector.shape_cast %20 : vector<16x16x24xbf16> to vector<256x24xbf16>
    %c1_30 = arith.constant 1 : index
    %c0_31 = arith.constant 0 : index
    %c0_32 = arith.constant 0 : index
    %22 = vector.load %arg5[%c1_30, %c0_31, %c0_32] : memref<3x24x8xbf16, #tpu.memory_space<vmem>>, vector<1x24x8xbf16>
    %23 = vector.shape_cast %22 : vector<1x24x8xbf16> to vector<24x8xbf16>
    %cst_33 = arith.constant dense<0.000000e+00> : vector<256x8xf32>
    %24 = tpu.matmul %21, %23, %cst_33 {dimension_numbers = #tpu.dot_dimension_numbers<[1], [0], [0], [1], [0, 0, 1, 1], [], []>} : vector<256x24xbf16>, vector<24x8xbf16>, vector<256x8xf32> -> vector<256x8xf32>
    %c2 = arith.constant 2 : index
    %c0_34 = arith.constant 0 : index
    %c0_35 = arith.constant 0 : index
    %25 = vector.load %arg10[%c2, %c0_34, %c0_35] : memref<18x16x24xbf16, #tpu.memory_space<vmem>>, vector<16x16x24xbf16>
    %26 = vector.shape_cast %25 : vector<16x16x24xbf16> to vector<256x24xbf16>
    %c2_36 = arith.constant 2 : index
    %c0_37 = arith.constant 0 : index
    %c0_38 = arith.constant 0 : index
    %27 = vector.load %arg5[%c2_36, %c0_37, %c0_38] : memref<3x24x8xbf16, #tpu.memory_space<vmem>>, vector<1x24x8xbf16>
    %28 = vector.shape_cast %27 : vector<1x24x8xbf16> to vector<24x8xbf16>
    %cst_39 = arith.constant dense<0.000000e+00> : vector<256x8xf32>
    %29 = tpu.matmul %26, %28, %cst_39 {dimension_numbers = #tpu.dot_dimension_numbers<[1], [0], [0], [1], [0, 0, 1, 1], [], []>} : vector<256x24xbf16>, vector<24x8xbf16>, vector<256x8xf32> -> vector<256x8xf32>
    %30 = arith.addf %19, %24 : vector<256x8xf32>
    %31 = arith.addf %30, %29 : vector<256x8xf32>
    %c0_40 = arith.constant 0 : index
    %c0_41 = arith.constant 0 : index
    %32 = vector.load %arg6[%c0_40, %c0_41] : memref<1x8xf32, #tpu.memory_space<vmem>>, vector<1x8xf32>
    %33 = vector.broadcast %32 : vector<1x8xf32> to vector<256x8xf32>
    %34 = arith.addf %31, %33 : vector<256x8xf32>
    %35 = vector.shape_cast %34 : vector<256x8xf32> to vector<16x16x8xf32>
    %36 = arith.truncf %35 : vector<16x16x8xf32> to vector<16x16x8xbf16>
    %c0_42 = arith.constant 0 : index
    %c0_43 = arith.constant 0 : index
    %c0_44 = arith.constant 0 : index
    %c0_45 = arith.constant 0 : index
    %37 = vector.load %arg7[%c0_42, %c0_43, %c0_44, %c0_45] : memref<1x16x16x8xbf16, #tpu.memory_space<vmem>>, vector<1x16x16x8xbf16>
    %38 = vector.shape_cast %37 : vector<1x16x16x8xbf16> to vector<16x16x8xbf16>
    %39 = vector.shape_cast %36 : vector<16x16x8xbf16> to vector<1x16x16x8xbf16>
    tpu.vector_store %arg7[%c0_42, %c0_43, %c0_44, %c0_45], %39 {strides = array<i32>} : memref<1x16x16x8xbf16, #tpu.memory_space<vmem>>, vector<1x16x16x8xbf16>,
    %cst_46 = arith.constant dense<0.000000e+00> : vector<8xf32>
    %40 = vector.multi_reduction <add>, %34, %cst_46 [0] : vector<256x8xf32> to vector<8xf32>
    %41 = vector.shape_cast %40 : vector<8xf32> to vector<1x1x1x8xf32>
    %c0_47 = arith.constant 0 : index
    %c0_48 = arith.constant 0 : index
    %c0_49 = arith.constant 0 : index
    %c0_50 = arith.constant 0 : index
    %42 = vector.load %arg8[%c0_47, %c0_48, %c0_49, %c0_50] : memref<1x1x1x8xf32, #tpu.memory_space<vmem>>, vector<1x1x1x8xf32>
    tpu.vector_store %arg8[%c0_47, %c0_48, %c0_49, %c0_50], %41 {strides = array<i32>} : memref<1x1x1x8xf32, #tpu.memory_space<vmem>>, vector<1x1x1x8xf32>,
    %43 = arith.mulf %34, %34 : vector<256x8xf32>
    %cst_51 = arith.constant dense<0.000000e+00> : vector<8xf32>
    %44 = vector.multi_reduction <add>, %43, %cst_51 [0] : vector<256x8xf32> to vector<8xf32>
    %45 = vector.shape_cast %44 : vector<8xf32> to vector<1x1x1x8xf32>
    %c0_52 = arith.constant 0 : index
    %c0_53 = arith.constant 0 : index
    %c0_54 = arith.constant 0 : index
    %c0_55 = arith.constant 0 : index
    %46 = vector.load %arg9[%c0_52, %c0_53, %c0_54, %c0_55] : memref<1x1x1x8xf32, #tpu.memory_space<vmem>>, vector<1x1x1x8xf32>
    tpu.vector_store %arg9[%c0_52, %c0_53, %c0_54, %c0_55], %45 {strides = array<i32>} : memref<1x1x1x8xf32, #tpu.memory_space<vmem>>, vector<1x1x1x8xf32>,
    return
  }
  func.func @transform_0(%arg0: i32, %arg1: i32) -> (i32, i32, i32, i32) {
    %c0_i32 = arith.constant 0 : i32
    %c0_i32_0 = arith.constant 0 : i32
    %c0_i32_1 = arith.constant 0 : i32
    return %arg0, %arg1, %c0_i32, %c0_i32_0 : i32, i32, i32, i32
  }
  func.func @transform_1(%arg0: i32, %arg1: i32) -> (i32, i32, i32, i32) {
    %c16_i32 = arith.constant 16 : i32
    %0 = arith.muli %arg1, %c16_i32 : i32
    %c1_i32 = arith.constant 1 : i32
    %1 = arith.subi %0, %c1_i32 : i32
    %c0_i32 = arith.constant 0 : i32
    %2 = arith.maxsi %1, %c0_i32 : i32
    %c0_i32_0 = arith.constant 0 : i32
    %c0_i32_1 = arith.constant 0 : i32
    %c0_i32_2 = arith.constant 0 : i32
    return %arg0, %2, %c0_i32_0, %c0_i32_1 : i32, i32, i32, i32
  }
  func.func @transform_2(%arg0: i32, %arg1: i32) -> (i32, i32, i32, i32) {
    %c16_i32 = arith.constant 16 : i32
    %0 = arith.muli %arg1, %c16_i32 : i32
    %c16_i32_0 = arith.constant 16 : i32
    %1 = arith.addi %0, %c16_i32_0 : i32
    %c15_i32 = arith.constant 15 : i32
    %2 = arith.minsi %1, %c15_i32 : i32
    %c0_i32 = arith.constant 0 : i32
    %c0_i32_1 = arith.constant 0 : i32
    %c0_i32_2 = arith.constant 0 : i32
    return %arg0, %2, %c0_i32, %c0_i32_1 : i32, i32, i32, i32
  }
  func.func @transform_3(%arg0: i32, %arg1: i32) -> (i32, i32, i32) {
    %c0_i32 = arith.constant 0 : i32
    %c0_i32_0 = arith.constant 0 : i32
    %c0_i32_1 = arith.constant 0 : i32
    %c0_i32_2 = arith.constant 0 : i32
    return %c0_i32, %c0_i32_0, %c0_i32_1 : i32, i32, i32
  }
  func.func @transform_4(%arg0: i32, %arg1: i32) -> (i32, i32) {
    %c0_i32 = arith.constant 0 : i32
    %c0_i32_0 = arith.constant 0 : i32
    %c0_i32_1 = arith.constant 0 : i32
    return %c0_i32, %c0_i32_0 : i32, i32
  }
  func.func @transform_5(%arg0: i32, %arg1: i32) -> (i32, i32, i32, i32) {
    %c0_i32 = arith.constant 0 : i32
    %c0_i32_0 = arith.constant 0 : i32
    %c0_i32_1 = arith.constant 0 : i32
    return %arg0, %arg1, %c0_i32, %c0_i32_0 : i32, i32, i32, i32
  }
  func.func @transform_6(%arg0: i32, %arg1: i32) -> (i32, i32, i32, i32) {
    %c0_i32 = arith.constant 0 : i32
    %c0_i32_0 = arith.constant 0 : i32
    %c0_i32_1 = arith.constant 0 : i32
    return %arg0, %arg1, %c0_i32, %c0_i32_0 : i32, i32, i32, i32
  }
  func.func @transform_7(%arg0: i32, %arg1: i32) -> (i32, i32, i32, i32) {
    %c0_i32 = arith.constant 0 : i32
    %c0_i32_0 = arith.constant 0 : i32
    %c0_i32_1 = arith.constant 0 : i32
    return %arg0, %arg1, %c0_i32, %c0_i32_0 : i32, i32, i32, i32
  }
}

</mosaic_0001>

<bundles_post_ra>
// kernel: double_conv.2
= control target key start
LH: loop header
LB: loop body
LE: loop exit
PB: predicated region body
PF: predicated region fallthrough
CT: control target
= control target key end

     0   :  { %s2471_s24 = smov 0   ;;  %s2473_s1 = smov 0   ;;  %s2810_s0 = inlined_call_operand.vmem [shape: bf16[2,16,16,12], index: 0, kind: input, shape index: {}, may-alias: {0,1,2}]   ;;  %s2811_s1 = inlined_call_operand.vmem [shape: bf16[2,16,16,12], index: 1, kind: input, shape index: {}, may-alias: {0,1,2}]   ;;  %s2812_s2 = inlined_call_operand.vmem [shape: bf16[2,16,16,12], index: 2, kind: input, shape index: {}, may-alias: {0,1,2}]   ;;  %s2813_s3 = inlined_call_operand.vmem [shape: bf16[3,12,8], index: 3, kind: input, shape index: {}]   ;;  %s2814_s4 = inlined_call_operand.vmem [shape: f32[1,8], index: 4, kind: input, shape index: {}]   ;;  %s2815_s5 = inlined_call_operand.vmem [shape: bf16[2,16,16,8], index: 5, kind: output, shape index: {0}]   ;;  %s2816_s6 = inlined_call_operand.vmem [shape: f32[2,1,1,8], index: 6, kind: output, shape index: {1}]   ;;  %s2817_s7 = inlined_call_operand.vmem [shape: f32[2,1,1,8], index: 7, kind: output, shape index: {2}]  }
   0x1   :  { %s2475_s2 = smov 0  }
   0x2 LB: > { %s30_s25 = sadd.s32 1, %s2424_s1  ;;  %p1985_p0 = scmp.ge.s32.totalorder %s2428_s2, 1  ;;  %s2428_s2 = sphi %s2475_s2, %s18_s2   ;;  %s2424_s1 = sphi %s2473_s1, %s2819_s1   ;;  %s2420_s24 = sphi %s2471_s24, %s2818_s24  }
   0x3   : > { %p32_p1 = scmp.ge.s32.totalorder %s30_s25, 2  ;;  %p332_p2 = scmp.lt.s32.totalorder %s2428_s2, 3 }
   0x5   : > { %s2821_s25 = smov (%p32_p1, %s30_s25), 0  ;;  %p333_p3 = pnand %p1985_p0, %p332_p2 }
   0x6   : > { %v2387_v0 = vld [vmem:[%s2813_s3 + $0x8] sm:$0x3f] (!%p333_p3)   ;;  %vm748_vm0 = vcmask (!%p333_p3), 1045504   ;;  %p413_p4 = scmp.lt.s32.totalorder (!%p333_p3), %s2420_s24, 1  ;;  %v2388_v1 = vld [vmem:[%s2813_s3 + $0x10] sm:$0x3f] (!%p333_p3)  }
   0x7   : > { %336 = sbr.rel (%p333_p3) target bundleno = 358 (0x166), region = 40  ;;  %2358 = vmatprep.subr.msk.bf16.mxu1 (!%p333_p3), %vm748_vm0, %v2387_v0  ;;  %v750_v2 = vsel (!%p333_p3), %vm748_vm0, %v2387_v0, 0  ;;  %v2391_v3 = vld [vmem:[%s2813_s3] sm:$0x3f] (!%p333_p3)   ;;  %2359 = vmatprep.subr.msk.bf16.mxu0 (!%p333_p3), %vm748_vm0, %v2388_v1  ;;  %v987_v4 = vsel (!%p333_p3), %vm748_vm0, %v2388_v1, 0  ;;  %v2430_v5 = vmov (!%p333_p3), 0  }
   0x8   : > { %2191 = vmatpush3.bf16.msra.mxu1 (!%p333_p3), %v750_v2  ;;  %v2010_v6 = vcombine.low (!%p333_p3), %v2430_v5, %v2430_v5  ;;  %2225 = vmatpush3.bf16.msra.mxu0 (!%p333_p3), %v987_v4  ;;  %vm610_vm1 = vcmask (!%p333_p3), 97280   ;;  %v1204_v18 = vsel (!%p333_p3), %vm748_vm0, %v2391_v3, 0  ;;  %v2616_v59 = vld [vmem:[%s2814_s4] ss:$0 sm:$0xff] (!%p333_p3)  ;;  %vm1566_vm2 = vcmask (!%p333_p3), 60416  }
   0x9   : > { %2360 = vmatprep.subr.msk.bf16.mxu1 (!%p333_p3), %vm748_vm0, %v2388_v1  ;;  %2361 = vmatprep.subr.msk.bf16.mxu0 (!%p333_p3), %vm748_vm0, %v2391_v3  ;;  %vm1599_vm3 = vcmask (!%p333_p3), 64512   ;;  %vm1669_vm4 = vcmask (!%p333_p3), 57344  }
   0xa   : > { %641 = vst.msk [vmem:[#allocation2] sm:$0xff] (!%p333_p3), %vm610_vm1, %v2010_v6  ;;  %657 = vst.msk [vmem:[#allocation2 + $0x88] sm:$0xff] (!%p333_p3), %vm610_vm1, %v2010_v6 }
   0xe   : > { %s2823_s24 = smov (!%p413_p4, %s2420_s24), 1 }
   0xf   : > { %s2102_s9 = sshll.u32 %s2823_s24, 7  ;;  %s473_s20 = scalar_lea.vmem %s2816_s6, %s2823_s24 }
  0x10   : > { %s2511_s12 = scalar_lea.vmem %s2810_s0, %s2102_s9  ;;  %s2624_s17 = scalar_lea.vmem %s2815_s5, %s2102_s9 }
  0x11   : > { %v2389_v7 = vld [vmem:[%s2511_s12] sm:$0xff]   ;;  %v2390_v8 = vld [vmem:[%s2511_s12 + $0x8] sm:$0xff]   ;;  %v2392_v9 = vld [vmem:[%s2511_s12 + $0x10] sm:$0xff]   ;;  %s479_s23 = scalar_lea.vmem %s2817_s7, %s2823_s24 }
  0x12   : > { %611 = vst.msk [vmem:[#allocation2 + $0x8] sm:$0xff] %vm610_vm1, %v2389_v7  ;;  %612 = vst.msk [vmem:[#allocation2 + $0x10] sm:$0xff] %vm610_vm1, %v2390_v8  ;;  %v2393_v10 = vld [vmem:[%s2511_s12 + $0x18] sm:$0xff]   ;;  %v2394_v11 = vld [vmem:[%s2511_s12 + $0x20] sm:$0xff]  }
  0x13   : > { %613 = vst.msk [vmem:[#allocation2 + $0x18] sm:$0xff] %vm610_vm1, %v2392_v9  ;;  %614 = vst.msk [vmem:[#allocation2 + $0x20] sm:$0xff] %vm610_vm1, %v2393_v10  ;;  %v2395_v12 = vld [vmem:[%s2511_s12 + $0x28] sm:$0xff]   ;;  %v2396_v13 = vld [vmem:[%s2511_s12 + $0x30] sm:$0xff]  }
  0x14   : > { %615 = vst.msk [vmem:[#allocation2 + $0x28] sm:$0xff] %vm610_vm1, %v2394_v11  ;;  %616 = vst.msk [vmem:[#allocation2 + $0x30] sm:$0xff] %vm610_vm1, %v2395_v12  ;;  %v2397_v14 = vld [vmem:[%s2511_s12 + $0x38] sm:$0xff]   ;;  %v2398_v15 = vld [vmem:[%s2511_s12 + $0x40] sm:$0xff]  }
  0x15   : > { %617 = vst.msk [vmem:[#allocation2 + $0x38] sm:$0xff] %vm610_vm1, %v2396_v13  ;;  %618 = vst.msk [vmem:[#allocation2 + $0x40] sm:$0xff] %vm610_vm1, %v2397_v14  ;;  %v2399_v19 = vld [vmem:[%s2511_s12 + $0x48] sm:$0xff]   ;;  %v2400_v22 = vld [vmem:[%s2511_s12 + $0x50] sm:$0xff]  }
  0x16   : > { %619 = vst.msk [vmem:[#allocation2 + $0x48] sm:$0xff] %vm610_vm1, %v2398_v15  ;;  %620 = vst.msk [vmem:[#allocation2 + $0x50] sm:$0xff] %vm610_vm1, %v2399_v19  ;;  %v2401_v23 = vld [vmem:[%s2511_s12 + $0x58] sm:$0xff]   ;;  %v2402_v24 = vld [vmem:[%s2511_s12 + $0x60] sm:$0xff]  }
  0x17   : > { %621 = vst.msk [vmem:[#allocation2 + $0x58] sm:$0xff] %vm610_vm1, %v2400_v22  ;;  %622 = vst.msk [vmem:[#allocation2 + $0x60] sm:$0xff] %vm610_vm1, %v2401_v23  ;;  %v2403_v26 = vld [vmem:[%s2511_s12 + $0x68] sm:$0xff]   ;;  %v2404_v28 = vld [vmem:[%s2511_s12 + $0x70] sm:$0xff]  }
  0x18   : > { %623 = vst.msk [vmem:[#allocation2 + $0x68] sm:$0xff] %vm610_vm1, %v2402_v24  ;;  %624 = vst.msk [vmem:[#allocation2 + $0x70] sm:$0xff] %vm610_vm1, %v2403_v26  ;;  %v2405_v29 = vld [vmem:[%s2511_s12 + $0x78] sm:$0xff]   ;;  %v658_v33 = vld [vmem:[#allocation2] sm:$0xff] }
  0x19   : > { %v676_v16 = vld [vmem:[#allocation2 + $0x8] sm:$0xff]  ;;  %v914_v17 = vld [vmem:[#allocation2 + $0x10] sm:$0xff]  ;;  %625 = vst.msk [vmem:[#allocation2 + $0x78] sm:$0xff] %vm610_vm1, %v2404_v28  ;;  %626 = vst.msk [vmem:[#allocation2 + $0x80] sm:$0xff] %vm610_vm1, %v2405_v29 }
  0x1a   : > { %2192 = vmatprep.mubr.msk.bf16.mxu1 %vm610_vm1, %v676_v16  ;;  %2226 = vmatprep.mubr.msk.bf16.mxu0 %vm610_vm1, %v914_v17  ;;  %v915_v20 = vld [vmem:[#allocation2 + $0x18] sm:$0xff]  ;;  %v916_v21 = vld [vmem:[#allocation2 + $0x20] sm:$0xff]  ;;  %v929_v41 = vld [vmem:[#allocation2 + $0x88] sm:$0xff] }
  0x1b   : > { %2193 = vmatmul.mubr.msk.bf16.vlgmr.msra.gmra.mrb[0].mxu1 %vm610_vm1, %v914_v17  ;;  %2227 = vmatmul.mubr.msk.bf16.vlgmr.msra.gmra.mrb[0].mxu0 %vm610_vm1, %v915_v20  ;;  %v917_v25 = vld [vmem:[#allocation2 + $0x28] sm:$0xff]  ;;  %v918_v27 = vld [vmem:[#allocation2 + $0x30] sm:$0xff] }
  0x1c   : > { %2293 = vmatpush3.bf16.msra.mxu1 %v987_v4  ;;  %2259 = vmatpush3.bf16.msra.mxu0 %v1204_v18  ;;  %v919_v30 = vld [vmem:[#allocation2 + $0x38] sm:$0xff]  ;;  %v920_v31 = vld [vmem:[#allocation2 + $0x40] sm:$0xff] }
  0x1d   : > { %2196 = vmatprep.mubr.msk.bf16.mxu1 %vm610_vm1, %v915_v20  ;;  %2230 = vmatprep.mubr.msk.bf16.mxu0 %vm610_vm1, %v916_v21  ;;  %v921_v32 = vld [vmem:[#allocation2 + $0x48] sm:$0xff]  ;;  %v685_v34 = vld [vmem:[#allocation2 + $0x50] sm:$0xff] }
  0x1e   : > { %v686_v35 = vld [vmem:[#allocation2 + $0x58] sm:$0xff]  ;;  %v687_v36 = vld [vmem:[#allocation2 + $0x60] sm:$0xff] }
  0x1f   : > { %v688_v37 = vld [vmem:[#allocation2 + $0x68] sm:$0xff]  ;;  %v689_v38 = vld [vmem:[#allocation2 + $0x70] sm:$0xff] }
  0x20   : > { %v690_v39 = vld [vmem:[#allocation2 + $0x78] sm:$0xff]  ;;  %v691_v40 = vld [vmem:[#allocation2 + $0x80] sm:$0xff] }
  0x23   : > { %2197 = vmatmul.mubr.msk.bf16.gmra.mrb[4].mxu1 %vm610_vm1, %v916_v21  ;;  %2231 = vmatmul.mubr.msk.bf16.gmra.mrb[4].mxu0 %vm610_vm1, %v917_v25 }
  0x24   : > { %2200 = vmatprep.mubr.msk.bf16.mxu1 %vm610_vm1, %v917_v25  ;;  %2234 = vmatprep.mubr.msk.bf16.mxu0 %vm610_vm1, %v918_v27 }
  0x2b   : > { %2201 = vmatmul.mubr.msk.bf16.gmra.mrb[8].mxu1 %vm610_vm1, %v918_v27  ;;  %2235 = vmatmul.mubr.msk.bf16.gmra.mrb[8].mxu0 %vm610_vm1, %v919_v30 }
  0x2c   : > { %2204 = vmatprep.mubr.msk.bf16.mxu1 %vm610_vm1, %v919_v30  ;;  %2238 = vmatprep.mubr.msk.bf16.mxu0 %vm610_vm1, %v920_v31 }
  0x33   : > { %2205 = vmatmul.mubr.msk.bf16.gmra.mrb[12].mxu1 %vm610_vm1, %v920_v31  ;;  %2239 = vmatmul.mubr.msk.bf16.gmra.mrb[12].mxu0 %vm610_vm1, %v921_v32 }
  0x34   : > { %2208 = vmatprep.mubr.msk.bf16.mxu1 %vm610_vm1, %v921_v32  ;;  %2260 = vmatprep.mubr.msk.bf16.mxu0 %vm610_vm1, %v658_v33 }
  0x3b   : > { %2209 = vmatmul.mubr.msk.bf16.gmra.mrb[16].mxu1 %vm610_vm1, %v685_v34  ;;  %2261 = vmatmul.mubr.msk.bf16.vlgmr.msra.gmra.mrb[0].mxu0 %vm610_vm1, %v676_v16 }
  0x3c   : > { %2212 = vmatprep.mubr.msk.bf16.mxu1 %vm610_vm1, %v686_v35  ;;  %2264 = vmatprep.mubr.msk.bf16.mxu0 %vm610_vm1, %v914_v17 }
  0x43   : > { %2213 = vmatmul.mubr.msk.bf16.gmra.mrb[20].mxu1 %vm610_vm1, %v687_v36  ;;  %2265 = vmatmul.mubr.msk.bf16.gmra.mrb[4].mxu0 %vm610_vm1, %v915_v20 }
  0x44   : > { %2216 = vmatprep.mubr.msk.bf16.mxu1 %vm610_vm1, %v688_v37  ;;  %2268 = vmatprep.mubr.msk.bf16.mxu0 %vm610_vm1, %v916_v21 }
  0x4b   : > { %2217 = vmatmul.mubr.msk.bf16.gmra.mrb[24].mxu1 %vm610_vm1, %v689_v38  ;;  %2269 = vmatmul.mubr.msk.bf16.gmra.mrb[8].mxu0 %vm610_vm1, %v917_v25 }
  0x4c   : > { %2220 = vmatprep.mubr.msk.bf16.mxu1 %vm610_vm1, %v690_v39  ;;  %2272 = vmatprep.mubr.msk.bf16.mxu0 %vm610_vm1, %v918_v27 }
  0x53   : > { %2221 = vmatmul.mubr.msk.bf16.gmra.mrb[28].mxu1 %vm610_vm1, %v691_v40  ;;  %2273 = vmatmul.mubr.msk.bf16.gmra.mrb[12].mxu0 %vm610_vm1, %v919_v30 }
  0x54   : > { %2242 = vmatprep.mubr.msk.bf16.mxu1 %vm610_vm1, %v685_v34  ;;  %2276 = vmatprep.mubr.msk.bf16.mxu0 %vm610_vm1, %v920_v31 }
  0x5b   : > { %2243 = vmatmul.mubr.msk.bf16.vlgmr.msra.gmra.mrb[16].mxu1 %vm610_vm1, %v686_v35  ;;  %2277 = vmatmul.mubr.msk.bf16.gmra.mrb[16].mxu0 %vm610_vm1, %v921_v32 }
  0x5c   : > { %2246 = vmatprep.mubr.msk.bf16.mxu1 %vm610_vm1, %v687_v36  ;;  %2280 = vmatprep.mubr.msk.bf16.mxu0 %vm610_vm1, %v685_v34 }
  0x63   : > { %2247 = vmatmul.mubr.msk.bf16.gmra.mrb[20].mxu1 %vm610_vm1, %v688_v37  ;;  %2281 = vmatmul.mubr.msk.bf16.gmra.mrb[20].mxu0 %vm610_vm1, %v686_v35 }
  0x64   : > { %2250 = vmatprep.mubr.msk.bf16.mxu1 %vm610_vm1, %v689_v38  ;;  %2284 = vmatprep.mubr.msk.bf16.mxu0 %vm610_vm1, %v687_v36 }
  0x6b   : > { %2251 = vmatmul.mubr.msk.bf16.gmra.mrb[24].mxu1 %vm610_vm1, %v690_v39  ;;  %2285 = vmatmul.mubr.msk.bf16.gmra.mrb[24].mxu0 %vm610_vm1, %v688_v37 }
  0x6c   : > { %2254 = vmatprep.mubr.msk.bf16.mxu1 %vm610_vm1, %v691_v40  ;;  %2288 = vmatprep.mubr.msk.bf16.mxu0 %vm610_vm1, %v689_v38 }
  0x73   : > { %2255 = vmatmul.mubr.msk.bf16.gmra.mrb[28].mxu1 %vm610_vm1, %v929_v41  ;;  %2289 = vmatmul.mubr.msk.bf16.gmra.mrb[28].mxu0 %vm610_vm1, %v690_v39 }
  0xee   : > { %v2194_v42 = vpop.f32.mrb[0].mxu1 }
  0xef   : > { %v786_v43 = vpop.f32.mrb[1].mxu1 }
  0xf0   : > { %v2195_v44 = vpop.f32.mrb[2].mxu1 }
  0xf1   : > { %v789_v45 = vpop.f32.mrb[3].mxu1 }
  0xf6   : > { %v2198_v46 = vpop.f32.mrb[4].mxu1 }
  0xf7   : > { %v802_v47 = vpop.f32.mrb[5].mxu1 }
  0xf8   : > { %v2199_v48 = vpop.f32.mrb[6].mxu1 }
  0xf9   : > { %v805_v49 = vpop.f32.mrb[7].mxu1 }
  0xfe   : > { %v2597_v50 = vpop.f32.mrb[8].mxu1 }
  0xff   : > { %v2599_v51 = vpop.f32.mrb[9].mxu1 }
 0x100   : > { %v2601_v52 = vpop.f32.mrb[10].mxu1 }
 0x101   : > { %v2603_v53 = vpop.f32.mrb[11].mxu1 }
 0x106   : > { %v2605_v54 = vpop.f32.mrb[12].mxu1 }
 0x107   : > { %v2607_v55 = vpop.f32.mrb[13].mxu1 }
 0x108   : > { %v2609_v56 = vpop.f32.mrb[14].mxu1 }
 0x109   : > { %v2611_v57 = vpop.f32.mrb[15].mxu1 }
 0x10e   : > { %v2262_v58 = vpop.f32.mrb[0].mxu0 }
 0x10f   : > { %v1249_v60 = vadd.f32 %v2262_v58, %v2194_v42  ;;  %v1240_v61 = vpop.f32.mrb[1].mxu0 }
 0x110   : > { %v1241_v62 = vadd.f32 %v1240_v61, %v786_v43  ;;  %v2263_v63 = vpop.f32.mrb[2].mxu0 }
 0x111   : > { %v1408_v0 = vadd.f32 %v2616_v59, %v1249_v60  ;;  %v1252_v1 = vadd.f32 %v2263_v63, %v2195_v44  ;;  %v1243_v2 = vpop.f32.mrb[3].mxu0 }
 0x112   : > { %v1406_v3 = vadd.f32 %v2616_v59, %v1241_v62  ;;  %v1244_v4 = vadd.f32 %v1243_v2, %v789_v45 }
 0x113   : > { %v2109_v5 = vpack.c.bf16 %v1408_v0, %v1408_v0  ;;  %v1409_v6 = vadd.f32 %v2616_v59, %v1252_v1  ;;  %v1673_v10 = vmul.f32 %v1408_v0, %v1408_v0  ;;  %v1603_v21 = vsel %vm1599_vm3, %v1408_v0, 0.0 }
 0x114   : > { %v2107_v7 = vpack.c.bf16 %v1406_v3, %v1406_v3  ;;  %v1671_v8 = vmul.f32 %v1406_v3, %v1406_v3  ;;  %v1407_v9 = vadd.f32 %v2616_v59, %v1244_v4  ;;  %v1600_v12 = vsel %vm1599_vm3, %v1406_v3, 0.0 }
 0x115   : > { %1569 = vst.msk [vmem:[%s2624_s17 + $0x8] sm:$0xf] %vm1566_vm2, %v2109_v5  ;;  %v2110_v11 = vpack.c.bf16 %v1409_v6, %v1409_v6  ;;  %v1674_v17 = vmul.f32 %v1409_v6, %v1409_v6  ;;  %v1706_v31 = vsel %vm1599_vm3, %v1673_v10, 0.0  ;;  %v1605_v34 = vsel %vm1599_vm3, %v1409_v6, 0.0 }
 0x116   : > { %1567 = vst.msk [vmem:[%s2624_s17] sm:$0xf] %vm1566_vm2, %v2107_v7  ;;  %v2108_v13 = vpack.c.bf16 %v1407_v9, %v1407_v9  ;;  %v1601_v14 = vsel %vm1599_vm3, %v1407_v9, 0.0  ;;  %v1672_v15 = vmul.f32 %v1407_v9, %v1407_v9  ;;  %v2266_v16 = vpop.f32.mrb[4].mxu0  ;;  %v1703_v22 = vsel %vm1599_vm3, %v1671_v8, 0.0 }
 0x117   : > { %1570 = vst.msk [vmem:[%s2624_s17 + $0xc] sm:$0xf] %vm1566_vm2, %v2110_v11  ;;  %v1602_v18 = vadd.f32 %v1601_v14, %v1600_v12  ;;  %v1265_v19 = vadd.f32 %v2266_v16, %v2198_v46  ;;  %v1256_v20 = vpop.f32.mrb[5].mxu0  ;;  %v1708_v35 = vsel %vm1599_vm3, %v1674_v17, 0.0 }
 0x118   : > { %1568 = vst.msk [vmem:[%s2624_s17 + $0x4] sm:$0xf] %vm1566_vm2, %v2108_v13  ;;  %v1704_v23 = vsel %vm1599_vm3, %v1672_v15, 0.0  ;;  %v1257_v24 = vadd.f32 %v1256_v20, %v802_v47  ;;  %v2267_v25 = vpop.f32.mrb[6].mxu0 }
 0x119   : > { %v1604_v26 = vadd.f32 %v1603_v21, %v1602_v18  ;;  %v1705_v27 = vadd.f32 %v1704_v23, %v1703_v22  ;;  %v1412_v28 = vadd.f32 %v2616_v59, %v1265_v19  ;;  %v1268_v29 = vadd.f32 %v2267_v25, %v2199_v48  ;;  %v1259_v30 = vpop.f32.mrb[7].mxu0 }
 0x11a   : > { %v1410_v32 = vadd.f32 %v2616_v59, %v1257_v24  ;;  %v1260_v33 = vadd.f32 %v1259_v30, %v805_v49 }
 0x11b   : > { %v1707_v36 = vadd.f32 %v1706_v31, %v1705_v27  ;;  %v2113_v37 = vpack.c.bf16 %v1412_v28, %v1412_v28  ;;  %v1606_v39 = vadd.f32 %v1605_v34, %v1604_v26  ;;  %v1413_v43 = vadd.f32 %v2616_v59, %v1268_v29 }
 0x11c   : > { %v2111_v38 = vpack.c.bf16 %v1410_v32, %v1410_v32  ;;  %v1607_v40 = vsel %vm1599_vm3, %v1410_v32, 0.0  ;;  %v1675_v41 = vmul.f32 %v1410_v32, %v1410_v32  ;;  %v1411_v44 = vadd.f32 %v2616_v59, %v1260_v33 }
 0x11d   : > { %1573 = vst.msk [vmem:[%s2624_s17 + $0x18] sm:$0xf] %vm1566_vm2, %v2113_v37  ;;  %v1709_v42 = vadd.f32 %v1708_v35, %v1707_v36  ;;  %v1608_v45 = vadd.f32 %v1607_v40, %v1606_v39  ;;  %v1677_v48 = vmul.f32 %v1412_v28, %v1412_v28  ;;  %v2114_v58 = vpack.c.bf16 %v1413_v43, %v1413_v43 }
 0x11e   : > { %1571 = vst.msk [vmem:[%s2624_s17 + $0x10] sm:$0xf] %vm1566_vm2, %v2111_v38  ;;  %v1710_v46 = vsel %vm1599_vm3, %v1675_v41, 0.0  ;;  %v2270_v47 = vpop.f32.mrb[8].mxu0  ;;  %v2112_v61 = vpack.c.bf16 %v1411_v44, %v1411_v44  ;;  %v1609_v62 = vsel %vm1599_vm3, %v1411_v44, 0.0  ;;  %v1676_v63 = vmul.f32 %v1411_v44, %v1411_v44 }
 0x11f   : > { %v1711_v49 = vadd.f32 %v1710_v46, %v1709_v42  ;;  %v1272_v60 = vpop.f32.mrb[9].mxu0  ;;  %v1281_v0 = vadd.f32 %v2270_v47, %v2597_v50  ;;  %v1611_v2 = vsel %vm1599_vm3, %v1412_v28, 0.0  ;;  %1574 = vst.msk [vmem:[%s2624_s17 + $0x1c] sm:$0xf] %vm1566_vm2, %v2114_v58  ;;  %v1610_v3 = vadd.f32 %v1609_v62, %v1608_v45 }
 0x120   : > { %v2271_v1 = vpop.f32.mrb[10].mxu0  ;;  %v1273_v4 = vadd.f32 %v1272_v60, %v2599_v51  ;;  %v1678_v7 = vmul.f32 %v1413_v43, %v1413_v43  ;;  %1572 = vst.msk [vmem:[%s2624_s17 + $0x14] sm:$0xf] %vm1566_vm2, %v2112_v61  ;;  %v1712_v8 = vsel %vm1599_vm3, %v1676_v63, 0.0  ;;  %v1714_v51 = vsel %vm1599_vm3, %v1677_v48, 0.0 }
 0x121   : > { %v1284_v5 = vadd.f32 %v2271_v1, %v2601_v52  ;;  %v1275_v6 = vpop.f32.mrb[11].mxu0  ;;  %v1416_v9 = vadd.f32 %v2616_v59, %v1281_v0  ;;  %v1612_v10 = vadd.f32 %v1611_v2, %v1610_v3  ;;  %v1713_v11 = vadd.f32 %v1712_v8, %v1711_v49 }
 0x122   : > { %v1276_v50 = vadd.f32 %v1275_v6, %v2603_v53  ;;  %v1414_v12 = vadd.f32 %v2616_v59, %v1273_v4  ;;  %v1613_v52 = vsel %vm1599_vm3, %v1413_v43, 0.0  ;;  %v1716_v19 = vsel %vm1599_vm3, %v1678_v7, 0.0 }
 0x123   : > { %v1417_v13 = vadd.f32 %v2616_v59, %v1284_v5  ;;  %v2117_v14 = vpack.c.bf16 %v1416_v9, %v1416_v9  ;;  %v1715_v16 = vadd.f32 %v1714_v51, %v1713_v11  ;;  %v1614_v18 = vadd.f32 %v1613_v52, %v1612_v10 }
 0x124   : > { %v1415_v15 = vadd.f32 %v2616_v59, %v1276_v50  ;;  %v2115_v17 = vpack.c.bf16 %v1414_v12, %v1414_v12  ;;  %v1615_v53 = vsel %vm1599_vm3, %v1414_v12, 0.0  ;;  %v1619_v20 = vsel %vm1599_vm3, %v1416_v9, 0.0 }
 0x125   : > { %1577 = vst.msk [vmem:[%s2624_s17 + $0x28] sm:$0xf] %vm1566_vm2, %v2117_v14  ;;  %v1679_v21 = vmul.f32 %v1414_v12, %v1414_v12  ;;  %v2118_v22 = vpack.c.bf16 %v1417_v13, %v1417_v13  ;;  %v1681_v24 = vmul.f32 %v1416_v9, %v1416_v9  ;;  %v1616_v25 = vadd.f32 %v1615_v53, %v1614_v18 }
 0x126   : > { %v2274_v23 = vpop.f32.mrb[12].mxu0  ;;  %1575 = vst.msk [vmem:[%s2624_s17 + $0x20] sm:$0xf] %vm1566_vm2, %v2115_v17  ;;  %v1717_v26 = vadd.f32 %v1716_v19, %v1715_v16  ;;  %v2116_v27 = vpack.c.bf16 %v1415_v15, %v1415_v15  ;;  %v1617_v30 = vsel %vm1599_vm3, %v1415_v15, 0.0  ;;  %v1680_v31 = vmul.f32 %v1415_v15, %v1415_v15 }
 0x127   : > { %v1288_v28 = vpop.f32.mrb[13].mxu0  ;;  %v1718_v29 = vsel %vm1599_vm3, %v1679_v21, 0.0  ;;  %1578 = vst.msk [vmem:[%s2624_s17 + $0x2c] sm:$0xf] %vm1566_vm2, %v2118_v22  ;;  %v1297_v32 = vadd.f32 %v2274_v23, %v2605_v54  ;;  %v1682_v35 = vmul.f32 %v1417_v13, %v1417_v13  ;;  %v1618_v36 = vadd.f32 %v1617_v30, %v1616_v25 }
 0x128   : > { %v2275_v33 = vpop.f32.mrb[14].mxu0  ;;  %v1719_v34 = vadd.f32 %v1718_v29, %v1717_v26  ;;  %1576 = vst.msk [vmem:[%s2624_s17 + $0x24] sm:$0xf] %vm1566_vm2, %v2116_v27  ;;  %v1289_v37 = vadd.f32 %v1288_v28, %v2607_v55  ;;  %v1720_v39 = vsel %vm1599_vm3, %v1680_v31, 0.0  ;;  %v1722_v45 = vsel %vm1599_vm3, %v1681_v24, 0.0 }
 0x129   : > { %v1291_v38 = vpop.f32.mrb[15].mxu0  ;;  %v1420_v40 = vadd.f32 %v2616_v59, %v1297_v32  ;;  %v1300_v41 = vadd.f32 %v2275_v33, %v2609_v56  ;;  %v1620_v43 = vadd.f32 %v1619_v20, %v1618_v36  ;;  %v1621_v46 = vsel %vm1599_vm3, %v1417_v13, 0.0 }
 0x12a   : > { %v1292_v42 = vadd.f32 %v1291_v38, %v2611_v57  ;;  %v1721_v54 = vadd.f32 %v1720_v39, %v1719_v34  ;;  %v1418_v44 = vadd.f32 %v2616_v59, %v1289_v37  ;;  %v1724_v57 = vsel %vm1599_vm3, %v1682_v35, 0.0 }
 0x12b   : > { %v2121_v55 = vpack.c.bf16 %v1420_v40, %v1420_v40  ;;  %v1421_v47 = vadd.f32 %v2616_v59, %v1300_v41  ;;  %v1622_v58 = vadd.f32 %v1621_v46, %v1620_v43  ;;  %v1685_v6 = vmul.f32 %v1420_v40, %v1420_v40 }
 0x12c   : > { %v1723_v48 = vadd.f32 %v1722_v45, %v1721_v54  ;;  %v2119_v49 = vpack.c.bf16 %v1418_v44, %v1418_v44  ;;  %v1623_v60 = vsel %vm1599_vm3, %v1418_v44, 0.0  ;;  %v1683_v61 = vmul.f32 %v1418_v44, %v1418_v44 }
 0x12d   : > { %1581 = vst.msk [vmem:[%s2624_s17 + $0x38] sm:$0xf] %vm1566_vm2, %v2121_v55  ;;  %v2122_v62 = vpack.c.bf16 %v1421_v47, %v1421_v47  ;;  %v1624_v1 = vadd.f32 %v1623_v60, %v1622_v58  ;;  %v1419_v3 = vadd.f32 %v2616_v59, %v1292_v42  ;;  %v1627_v17 = vsel %vm1599_vm3, %v1420_v40, 0.0 }
 0x12e   : > { %v2244_v56 = vpop.f32.mrb[16].mxu1  ;;  %v2278_v63 = vpop.f32.mrb[16].mxu0  ;;  %1579 = vst.msk [vmem:[%s2624_s17 + $0x30] sm:$0xf] %vm1566_vm2, %v2119_v49  ;;  %v1725_v2 = vadd.f32 %v1724_v57, %v1723_v48  ;;  %v1726_v7 = vsel %vm1599_vm3, %v1683_v61, 0.0  ;;  %v1686_v18 = vmul.f32 %v1421_v47, %v1421_v47  ;;  %v1730_v20 = vsel %vm1599_vm3, %v1685_v6, 0.0 }
 0x12f   : > { %v1087_v0 = vpop.f32.mrb[17].mxu1  ;;  %v1304_v4 = vpop.f32.mrb[17].mxu0  ;;  %1582 = vst.msk [vmem:[%s2624_s17 + $0x3c] sm:$0xf] %vm1566_vm2, %v2122_v62  ;;  %v2310_v8 = vadd.f32 %v2278_v63, %v2244_v56  ;;  %v2120_v12 = vpack.c.bf16 %v1419_v3, %v1419_v3  ;;  %v1625_v13 = vsel %vm1599_vm3, %v1419_v3, 0.0  ;;  %v1684_v14 = vmul.f32 %v1419_v3, %v1419_v3 }
 0x130   : > { %v2245_v5 = vpop.f32.mrb[18].mxu1  ;;  %v2311_v9 = vadd.f32 %v1304_v4, %v1087_v0  ;;  %v2279_v50 = vpop.f32.mrb[18].mxu0  ;;  %v1727_v11 = vadd.f32 %v1726_v7, %v1725_v2  ;;  %v1626_v52 = vadd.f32 %v1625_v13, %v1624_v1  ;;  %v1629_v24 = vsel %vm1599_vm3, %v1421_v47, 0.0 }
 0x131   : > { %v1090_v10 = vpop.f32.mrb[19].mxu1  ;;  %v1307_v51 = vpop.f32.mrb[19].mxu0  ;;  %v1424_v15 = vadd.f32 %v2310_v8, %v2616_v59  ;;  %1580 = vst.msk [vmem:[%s2624_s17 + $0x34] sm:$0xf] %vm1566_vm2, %v2120_v12  ;;  %v2312_v53 = vadd.f32 %v2279_v50, %v2245_v5  ;;  %v1728_v22 = vsel %vm1599_vm3, %v1684_v14, 0.0  ;;  %v1732_v35 = vsel %vm1599_vm3, %v1686_v18, 0.0 }
 0x132   : > { %v1422_v16 = vadd.f32 %v2311_v9, %v2616_v59  ;;  %v2313_v19 = vadd.f32 %v1307_v51, %v1090_v10  ;;  %v1628_v21 = vadd.f32 %v1627_v17, %v1626_v52  ;;  %v1729_v25 = vadd.f32 %v1728_v22, %v1727_v11 }
 0x133   : > { %v2125_v23 = vpack.c.bf16 %v1424_v15, %v1424_v15  ;;  %v1425_v31 = vadd.f32 %v2312_v53, %v2616_v59  ;;  %v1635_v40 = vsel %vm1599_vm3, %v1424_v15, 0.0  ;;  %v1689_v45 = vmul.f32 %v1424_v15, %v1424_v15 }
 0x134   : > { %v2123_v26 = vpack.c.bf16 %v1422_v16, %v1422_v16  ;;  %v1631_v27 = vsel %vm1599_vm3, %v1422_v16, 0.0  ;;  %v1630_v29 = vadd.f32 %v1629_v24, %v1628_v21  ;;  %v1687_v30 = vmul.f32 %v1422_v16, %v1422_v16 }
 0x135   : > { %1585 = vst.msk [vmem:[%s2624_s17 + $0x48] sm:$0xf] %vm1566_vm2, %v2125_v23  ;;  %v1423_v32 = vadd.f32 %v2313_v19, %v2616_v59  ;;  %v1731_v36 = vadd.f32 %v1730_v20, %v1729_v25  ;;  %v2126_v43 = vpack.c.bf16 %v1425_v31, %v1425_v31  ;;  %v1690_v61 = vmul.f32 %v1425_v31, %v1425_v31 }
 0x136   : > { %v2248_v28 = vpop.f32.mrb[20].mxu1  ;;  %v2282_v33 = vpop.f32.mrb[20].mxu0  ;;  %1583 = vst.msk [vmem:[%s2624_s17 + $0x40] sm:$0xf] %vm1566_vm2, %v2123_v26  ;;  %v1632_v41 = vadd.f32 %v1631_v27, %v1630_v29  ;;  %v1734_v42 = vsel %vm1599_vm3, %v1687_v30, 0.0  ;;  %v1637_v3 = vsel %vm1599_vm3, %v1425_v31, 0.0 }
 0x137   : > { %v1103_v34 = vpop.f32.mrb[21].mxu1  ;;  %v2314_v37 = vadd.f32 %v2282_v33, %v2248_v28  ;;  %v1320_v38 = vpop.f32.mrb[21].mxu0  ;;  %v1733_v46 = vadd.f32 %v1732_v35, %v1731_v36  ;;  %v2124_v55 = vpack.c.bf16 %v1423_v32, %v1423_v32  ;;  %v1633_v47 = vsel %vm1599_vm3, %v1423_v32, 0.0  ;;  %1586 = vst.msk [vmem:[%s2624_s17 + $0x4c] sm:$0xf] %vm1566_vm2, %v2126_v43 }
 0x138   : > { %v2249_v39 = vpop.f32.mrb[22].mxu1  ;;  %v2283_v54 = vpop.f32.mrb[22].mxu0  ;;  %v1634_v49 = vadd.f32 %v1633_v47, %v1632_v41  ;;  %v1688_v58 = vmul.f32 %v1423_v32, %v1423_v32  ;;  %v2315_v56 = vadd.f32 %v1320_v38, %v1103_v34  ;;  %v1738_v8 = vsel %vm1599_vm3, %v1689_v45, 0.0 }
 0x139   : > { %v1106_v44 = vpop.f32.mrb[23].mxu1  ;;  %v1323_v48 = vpop.f32.mrb[23].mxu0  ;;  %v1428_v60 = vadd.f32 %v2314_v37, %v2616_v59  ;;  %v1735_v57 = vadd.f32 %v1734_v42, %v1733_v46  ;;  %1584 = vst.msk [vmem:[%s2624_s17 + $0x44] sm:$0xf] %vm1566_vm2, %v2124_v55  ;;  %v2316_v62 = vadd.f32 %v2283_v54, %v2249_v39  ;;  %v1740_v12 = vsel %vm1599_vm3, %v1690_v61, 0.0 }
 0x13a   : > { %v2317_v63 = vadd.f32 %v1323_v48, %v1106_v44  ;;  %v1636_v0 = vadd.f32 %v1635_v40, %v1634_v49  ;;  %v1736_v1 = vsel %vm1599_vm3, %v1688_v58, 0.0  ;;  %v1426_v5 = vadd.f32 %v2315_v56, %v2616_v59 }
 0x13b   : > { %v2129_v2 = vpack.c.bf16 %v1428_v60, %v1428_v60  ;;  %v1737_v4 = vadd.f32 %v1736_v1, %v1735_v57  ;;  %v1429_v6 = vadd.f32 %v2316_v62, %v2616_v59  ;;  %v1643_v16 = vsel %vm1599_vm3, %v1428_v60, 0.0 }
 0x13c   : > { %v1638_v9 = vadd.f32 %v1637_v3, %v1636_v0  ;;  %v1427_v50 = vadd.f32 %v2317_v63, %v2616_v59  ;;  %v2127_v51 = vpack.c.bf16 %v1426_v5, %v1426_v5  ;;  %v1639_v52 = vsel %vm1599_vm3, %v1426_v5, 0.0 }
 0x13d   : > { %1589 = vst.msk [vmem:[%s2624_s17 + $0x58] sm:$0xf] %vm1566_vm2, %v2129_v2  ;;  %v1739_v13 = vadd.f32 %v1738_v8, %v1737_v4  ;;  %v1691_v18 = vmul.f32 %v1426_v5, %v1426_v5  ;;  %v2130_v53 = vpack.c.bf16 %v1429_v6, %v1429_v6  ;;  %v1693_v21 = vmul.f32 %v1428_v60, %v1428_v60 }
 0x13e   : > { %v2252_v7 = vpop.f32.mrb[24].mxu1  ;;  %v2286_v10 = vpop.f32.mrb[24].mxu0  ;;  %v1640_v17 = vadd.f32 %v1639_v52, %v1638_v9  ;;  %1587 = vst.msk [vmem:[%s2624_s17 + $0x50] sm:$0xf] %vm1566_vm2, %v2127_v51  ;;  %v2128_v23 = vpack.c.bf16 %v1427_v50, %v1427_v50  ;;  %v1641_v24 = vsel %vm1599_vm3, %v1427_v50, 0.0  ;;  %v1692_v28 = vmul.f32 %v1427_v50, %v1427_v50 }
 0x13f   : > { %v1119_v11 = vpop.f32.mrb[25].mxu1  ;;  %v1336_v14 = vpop.f32.mrb[25].mxu0  ;;  %v1741_v22 = vadd.f32 %v1740_v12, %v1739_v13  ;;  %v1742_v26 = vsel %vm1599_vm3, %v1691_v18, 0.0  ;;  %1590 = vst.msk [vmem:[%s2624_s17 + $0x5c] sm:$0xf] %vm1566_vm2, %v2130_v53  ;;  %v2318_v29 = vadd.f32 %v2286_v10, %v2252_v7  ;;  %v1694_v31 = vmul.f32 %v1429_v6, %v1429_v6 }
 0x140   : > { %v2253_v15 = vpop.f32.mrb[26].mxu1  ;;  %v2287_v19 = vpop.f32.mrb[26].mxu0  ;;  %v1642_v27 = vadd.f32 %v1641_v24, %v1640_v17  ;;  %1588 = vst.msk [vmem:[%s2624_s17 + $0x54] sm:$0xf] %vm1566_vm2, %v2128_v23  ;;  %v2319_v32 = vadd.f32 %v1336_v14, %v1119_v11  ;;  %v1744_v35 = vsel %vm1599_vm3, %v1692_v28, 0.0  ;;  %v1645_v38 = vsel %vm1599_vm3, %v1429_v6, 0.0 }
 0x141   : > { %v1122_v20 = vpop.f32.mrb[27].mxu1  ;;  %v1339_v25 = vpop.f32.mrb[27].mxu0  ;;  %v1743_v30 = vadd.f32 %v1742_v26, %v1741_v22  ;;  %v2320_v33 = vadd.f32 %v2287_v19, %v2253_v15  ;;  %v1432_v36 = vadd.f32 %v2318_v29, %v2616_v59  ;;  %v1746_v43 = vsel %vm1599_vm3, %v1693_v21, 0.0 }
 0x142   : > { %v1644_v34 = vadd.f32 %v1643_v16, %v1642_v27  ;;  %v2321_v37 = vadd.f32 %v1339_v25, %v1122_v20  ;;  %v1430_v40 = vadd.f32 %v2319_v32, %v2616_v59  ;;  %v1748_v56 = vsel %vm1599_vm3, %v1694_v31, 0.0 }
 0x143   : > { %v1745_v39 = vadd.f32 %v1744_v35, %v1743_v30  ;;  %v1433_v41 = vadd.f32 %v2320_v33, %v2616_v59  ;;  %v2133_v54 = vpack.c.bf16 %v1432_v36, %v1432_v36  ;;  %v1697_v8 = vmul.f32 %v1432_v36, %v1432_v36 }
 0x144   : > { %v1646_v44 = vadd.f32 %v1645_v38, %v1644_v34  ;;  %v2131_v47 = vpack.c.bf16 %v1430_v40, %v1430_v40  ;;  %v1647_v48 = vsel %vm1599_vm3, %v1430_v40, 0.0  ;;  %v1695_v49 = vmul.f32 %v1430_v40, %v1430_v40 }
 0x145   : > { %v1747_v55 = vadd.f32 %v1746_v43, %v1745_v39  ;;  %1593 = vst.msk [vmem:[%s2624_s17 + $0x68] sm:$0xf] %vm1566_vm2, %v2133_v54  ;;  %v2134_v61 = vpack.c.bf16 %v1433_v41, %v1433_v41  ;;  %v1431_v2 = vadd.f32 %v2321_v37, %v2616_v59  ;;  %v1651_v52 = vsel %vm1599_vm3, %v1432_v36, 0.0 }
 0x146   : > { %v2256_v42 = vpop.f32.mrb[28].mxu1  ;;  %v2290_v45 = vpop.f32.mrb[28].mxu0  ;;  %v1648_v57 = vadd.f32 %v1647_v48, %v1646_v44  ;;  %1591 = vst.msk [vmem:[%s2624_s17 + $0x60] sm:$0xf] %vm1566_vm2, %v2131_v47  ;;  %v1750_v1 = vsel %vm1599_vm3, %v1695_v49, 0.0  ;;  %v1698_v14 = vmul.f32 %v1433_v41, %v1433_v41  ;;  %v1653_v19 = vsel %vm1599_vm3, %v1433_v41, 0.0 }
 0x147   : > { %v1135_v46 = vpop.f32.mrb[29].mxu1  ;;  %v1352_v58 = vpop.f32.mrb[29].mxu0  ;;  %v1749_v0 = vadd.f32 %v1748_v56, %v1747_v55  ;;  %1594 = vst.msk [vmem:[%s2624_s17 + $0x6c] sm:$0xf] %vm1566_vm2, %v2134_v61  ;;  %v2322_v4 = vadd.f32 %v2290_v45, %v2256_v42  ;;  %v2132_v50 = vpack.c.bf16 %v1431_v2, %v1431_v2  ;;  %v1649_v10 = vsel %vm1599_vm3, %v1431_v2, 0.0 }
 0x148   : > { %v2257_v60 = vpop.f32.mrb[30].mxu1  ;;  %v2291_v62 = vpop.f32.mrb[30].mxu0  ;;  %v2323_v5 = vadd.f32 %v1352_v58, %v1135_v46  ;;  %v1650_v11 = vadd.f32 %v1649_v10, %v1648_v57  ;;  %v1696_v12 = vmul.f32 %v1431_v2, %v1431_v2  ;;  %v1754_v23 = vsel %vm1599_vm3, %v1697_v8, 0.0 }
 0x149   : > { %v1138_v63 = vpop.f32.mrb[31].mxu1  ;;  %v1355_v3 = vpop.f32.mrb[31].mxu0  ;;  %v2324_v6 = vadd.f32 %v2291_v62, %v2257_v60  ;;  %v1751_v9 = vadd.f32 %v1750_v1, %v1749_v0  ;;  %v1436_v13 = vadd.f32 %v2322_v4, %v2616_v59  ;;  %1592 = vst.msk [vmem:[%s2624_s17 + $0x64] sm:$0xf] %vm1566_vm2, %v2132_v50 }
 0x14a   : > { %v2325_v7 = vadd.f32 %v1355_v3, %v1138_v63  ;;  %v1434_v51 = vadd.f32 %v2323_v5, %v2616_v59  ;;  %v1652_v17 = vadd.f32 %v1651_v52, %v1650_v11  ;;  %v1752_v18 = vsel %vm1599_vm3, %v1696_v12, 0.0 }
 0x14b   : > { %v1437_v15 = vadd.f32 %v2324_v6, %v2616_v59  ;;  %v2137_v53 = vpack.c.bf16 %v1436_v13, %v1436_v13  ;;  %v1753_v20 = vadd.f32 %v1752_v18, %v1751_v9  ;;  %v1701_v34 = vmul.f32 %v1436_v13, %v1436_v13 }
 0x14c   : > { %v1435_v16 = vadd.f32 %v2325_v7, %v2616_v59  ;;  %v2135_v21 = vpack.c.bf16 %v1434_v51, %v1434_v51  ;;  %v1655_v22 = vsel %vm1599_vm3, %v1434_v51, 0.0  ;;  %v1654_v24 = vadd.f32 %v1653_v19, %v1652_v17 }
 0x14d   : > { %1597 = vst.msk [vmem:[%s2624_s17 + $0x78] sm:$0xf] %vm1566_vm2, %v2137_v53  ;;  %v1699_v25 = vmul.f32 %v1434_v51, %v1434_v51  ;;  %v2138_v26 = vpack.c.bf16 %v1437_v15, %v1437_v15  ;;  %v1756_v59 = vsel %vm1599_vm3, %v1698_v14, 0.0  ;;  %v1755_v27 = vadd.f32 %v1754_v23, %v1753_v20 }
 0x14e   : > { %1595 = vst.msk [vmem:[%s2624_s17 + $0x70] sm:$0xf] %vm1566_vm2, %v2135_v21  ;;  %v2136_v28 = vpack.c.bf16 %v1435_v16, %v1435_v16  ;;  %v1656_v29 = vadd.f32 %v1655_v22, %v1654_v24  ;;  %v1657_v31 = vsel %vm1599_vm3, %v1435_v16, 0.0  ;;  %v1700_v32 = vmul.f32 %v1435_v16, %v1435_v16 }
 0x14f   : > { %v1758_v30 = vsel %vm1599_vm3, %v1699_v25, 0.0  ;;  %1598 = vst.msk [vmem:[%s2624_s17 + $0x7c] sm:$0xf] %vm1566_vm2, %v2138_v26  ;;  %v1757_v33 = vadd.f32 %v1756_v59, %v1755_v27  ;;  %v1659_v37 = vsel %vm1599_vm3, %v1436_v13, 0.0  ;;  %v1702_v39 = vmul.f32 %v1437_v15, %v1437_v15 }
 0x150   : > { %1596 = vst.msk [vmem:[%s2624_s17 + $0x74] sm:$0xf] %vm1566_vm2, %v2136_v28  ;;  %v1658_v35 = vadd.f32 %v1657_v31, %v1656_v29  ;;  %v1760_v36 = vsel %vm1599_vm3, %v1700_v32, 0.0  ;;  %v1661_v41 = vsel %vm1599_vm3, %v1437_v15, 0.0  ;;  %v1762_v43 = vsel %vm1599_vm3, %v1701_v34, 0.0 }
 0x151   : > { %v1759_v38 = vadd.f32 %v1758_v30, %v1757_v33  ;;  %v1764_v45 = vsel %vm1599_vm3, %v1702_v39, 0.0 }
 0x152   : > { %v1660_v40 = vadd.f32 %v1659_v37, %v1658_v35 }
 0x153   : > { %v1761_v42 = vadd.f32 %v1760_v36, %v1759_v38 }
 0x154   : > { %v1662_v54 = vadd.f32 %v1661_v41, %v1660_v40 }
 0x155   : > { %v1763_v44 = vadd.f32 %v1762_v43, %v1761_v42 }
 0x156   : > { %v1663_v46 = vrot.slane %v1662_v54, 4 }
 0x157   : > { %v1765_v55 = vadd.f32 %v1764_v45, %v1763_v44 }
 0x158   : > { %v1664_v47 = vadd.f32 %v1663_v46, %v1662_v54 }
 0x159   : > { %v1766_v48 = vrot.slane %v1765_v55, 4 }
 0x15a   : > { %v1665_v49 = vrot.slane %v1664_v47, 2 }
 0x15b   : > { %v1767_v58 = vadd.f32 %v1766_v48, %v1765_v55 }
 0x15c   : > { %v1666_v60 = vadd.f32 %v1665_v49, %v1664_v47 }
 0x15d   : > { %v1768_v56 = vrot.slane %v1767_v58, 2 }
 0x15e   : > { %v1667_v57 = vrot.slane %v1666_v60, 1 }
 0x15f   : > { %v1769_v61 = vadd.f32 %v1768_v56, %v1767_v58 }
 0x160   : > { %v1668_v62 = vadd.f32 %v1667_v57, %v1666_v60 }
 0x161   : > { %v1770_v63 = vrot.slane %v1769_v61, 1 }
 0x162   : > { %1670 = vst.msk [vmem:[%s473_s20] sm:$0x1] %vm1669_vm4, %v1668_v62 }
 0x163   : > { %v1771_v0 = vadd.f32 %v1770_v63, %v1769_v61 }
 0x165   : > { %1772 = vst.msk [vmem:[%s479_s23] sm:$0x1] %vm1669_vm4, %v1771_v0 }
 0x166 PF: > { %s18_s2 = sadd.s32 1, %s2428_s2   ;;  %s2818_s24 = smov %s2424_s1 }
 0x167   : > { %p15_p5 = scmp.ge.s32.totalorder %s18_s2, 4   ;;  %s2819_s1 = smov %s2821_s25 }
 0x169   :  { %17 = sbr.rel (!%p15_p5) target bundleno = 2 (0x2), region = 105 }

// kernel: double_conv.3
= control target key start
LH: loop header
LB: loop body
LE: loop exit
PB: predicated region body
PF: predicated region fallthrough
CT: control target
= control target key end

     0   :  { %s2505_s24 = smov 0   ;;  %s2507_s1 = smov 0   ;;  %s2853_s0 = inlined_call_operand.vmem [shape: bf16[2,16,16,24], index: 0, kind: input, shape index: {}, may-alias: {0,1,2}]   ;;  %s2854_s1 = inlined_call_operand.vmem [shape: bf16[2,16,16,24], index: 1, kind: input, shape index: {}, may-alias: {0,1,2}]   ;;  %s2855_s2 = inlined_call_operand.vmem [shape: bf16[2,16,16,24], index: 2, kind: input, shape index: {}, may-alias: {0,1,2}]   ;;  %s2856_s3 = inlined_call_operand.vmem [shape: bf16[3,24,8], index: 3, kind: input, shape index: {}]   ;;  %s2857_s4 = inlined_call_operand.vmem [shape: f32[1,8], index: 4, kind: input, shape index: {}]   ;;  %s2858_s5 = inlined_call_operand.vmem [shape: bf16[2,16,16,8], index: 5, kind: output, shape index: {0}]   ;;  %s2859_s6 = inlined_call_operand.vmem [shape: f32[2,1,1,8], index: 6, kind: output, shape index: {1}]   ;;  %s2860_s7 = inlined_call_operand.vmem [shape: f32[2,1,1,8], index: 7, kind: output, shape index: {2}]  }
   0x1   :  { %s2509_s2 = smov 0  }
   0x2 LB: > { %s30_s25 = sadd.s32 1, %s2458_s1  ;;  %p2000_p0 = scmp.ge.s32.totalorder %s2462_s2, 1  ;;  %s2462_s2 = sphi %s2509_s2, %s18_s2   ;;  %s2458_s1 = sphi %s2507_s1, %s2862_s1   ;;  %s2454_s24 = sphi %s2505_s24, %s2861_s24  }
   0x3   : > { %p32_p1 = scmp.ge.s32.totalorder %s30_s25, 2  ;;  %p332_p2 = scmp.lt.s32.totalorder %s2462_s2, 3 }
   0x5   : > { %s2864_s25 = smov (%p32_p1, %s30_s25), 0  ;;  %p333_p3 = pnand %p2000_p0, %p332_p2 }
   0x6   : > { %v2418_v0 = vld [vmem:[%s2856_s3 + $0xc] sm:$0xff] (!%p333_p3)   ;;  %vm754_vm0 = vcmask (!%p333_p3), 1043456   ;;  %v2419_v1 = vld [vmem:[%s2856_s3 + $0x18] sm:$0xff] (!%p333_p3)   ;;  %p413_p4 = scmp.lt.s32.totalorder (!%p333_p3), %s2454_s24, 1  ;;  %v2420_v2 = vld [vmem:[%s2856_s3 + $0x14] ss:$0 sps:$4 sm:$0xff] (!%p333_p3)  }
   0x7   : > { %336 = sbr.rel (%p333_p3) target bundleno = 358 (0x166), region = 40  ;;  %2213 = vmatprep.subr.bf16.mxu1 (!%p333_p3), %v2418_v0  ;;  %2249 = vmatprep.subr.bf16.mxu0 (!%p333_p3), %v2419_v1  ;;  %v2421_v3 = vld [vmem:[%s2856_s3 + $0x20] ss:$0 sps:$4 sm:$0xff] (!%p333_p3)   ;;  %v756_v4 = vsel (!%p333_p3), %vm754_vm0, %v2420_v2, 0  ;;  %vm610_vm1 = vcmask (!%p333_p3), 195584   ;;  %v2464_v7 = vmov (!%p333_p3), 0  }
   0x8   : > { %2214 = vmatpush3.bf16.msra.mxu1 (!%p333_p3), %v2418_v0  ;;  %2250 = vmatpush3.bf16.msra.mxu0 (!%p333_p3), %v2419_v1  ;;  %v998_v5 = vsel (!%p333_p3), %vm754_vm0, %v2421_v3, 0  ;;  %v2424_v6 = vld [vmem:[%s2856_s3] sm:$0xff] (!%p333_p3)   ;;  %v2025_v8 = vcombine.low (!%p333_p3), %v2464_v7, %v2464_v7  ;;  %v2429_v19 = vld [vmem:[%s2856_s3 + $0x8] ss:$0 sps:$4 sm:$0xff] (!%p333_p3)   ;;  %vm1581_vm2 = vcmask (!%p333_p3), 60416   ;;  %vm1614_vm3 = vcmask (!%p333_p3), 64512  }
   0x9   : > { %2389 = vmatprep.subr.msk.bf16.mxu1 (!%p333_p3), %vm754_vm0, %v2420_v2  ;;  %2390 = vmatprep.subr.msk.bf16.mxu0 (!%p333_p3), %vm754_vm0, %v2421_v3  ;;  %v1219_v26 = vsel (!%p333_p3), %vm754_vm0, %v2429_v19, 0  ;;  %v2659_v62 = vld [vmem:[%s2857_s4] ss:$0 sm:$0xff] (!%p333_p3)  ;;  %vm1684_vm4 = vcmask (!%p333_p3), 57344  }
   0xa   : > { %641 = vst.msk [vmem:[#allocation2] sm:$0xff] (!%p333_p3), %vm610_vm1, %v2025_v8  ;;  %657 = vst.msk [vmem:[#allocation2 + $0x88] sm:$0xff] (!%p333_p3), %vm610_vm1, %v2025_v8 }
   0xc   : > { %2216 = vmatpush3.bf16.msra.mxu1 (!%p333_p3), %v756_v4  ;;  %2252 = vmatpush3.bf16.msra.mxu0 (!%p333_p3), %v998_v5 }
   0xd   : > { %2321 = vmatprep.subr.bf16.mxu1 (!%p333_p3), %v2419_v1  ;;  %2285 = vmatprep.subr.bf16.mxu0 (!%p333_p3), %v2424_v6 }
   0xe   : > { %s2866_s24 = smov (!%p413_p4, %s2454_s24), 1 }
   0xf   : > { %s2122_s11 = sshll.u32 %s2866_s24, 7  ;;  %s473_s28 = scalar_lea.vmem %s2859_s6, %s2866_s24 }
  0x10   : > { %s2550_s16 = scalar_lea.vmem %s2853_s0, %s2122_s11  ;;  %s2667_s23 = scalar_lea.vmem %s2858_s5, %s2122_s11 }
  0x11   : > { %v2422_v9 = vld [vmem:[%s2550_s16] sm:$0xff]   ;;  %v2423_v10 = vld [vmem:[%s2550_s16 + $0x8] sm:$0xff]   ;;  %v2425_v11 = vld [vmem:[%s2550_s16 + $0x10] sm:$0xff]   ;;  %s479_s8 = scalar_lea.vmem %s2860_s7, %s2866_s24 }
  0x12   : > { %611 = vst.msk [vmem:[#allocation2 + $0x8] sm:$0xff] %vm610_vm1, %v2422_v9  ;;  %612 = vst.msk [vmem:[#allocation2 + $0x10] sm:$0xff] %vm610_vm1, %v2423_v10  ;;  %v2426_v12 = vld [vmem:[%s2550_s16 + $0x18] sm:$0xff]   ;;  %v2427_v13 = vld [vmem:[%s2550_s16 + $0x20] sm:$0xff]  }
  0x13   : > { %613 = vst.msk [vmem:[#allocation2 + $0x18] sm:$0xff] %vm610_vm1, %v2425_v11  ;;  %614 = vst.msk [vmem:[#allocation2 + $0x20] sm:$0xff] %vm610_vm1, %v2426_v12  ;;  %v2428_v14 = vld [vmem:[%s2550_s16 + $0x28] sm:$0xff]   ;;  %v2430_v15 = vld [vmem:[%s2550_s16 + $0x30] sm:$0xff]  }
  0x14   : > { %615 = vst.msk [vmem:[#allocation2 + $0x28] sm:$0xff] %vm610_vm1, %v2427_v13  ;;  %616 = vst.msk [vmem:[#allocation2 + $0x30] sm:$0xff] %vm610_vm1, %v2428_v14  ;;  %v2431_v16 = vld [vmem:[%s2550_s16 + $0x38] sm:$0xff]   ;;  %v2432_v17 = vld [vmem:[%s2550_s16 + $0x40] sm:$0xff]  }
  0x15   : > { %617 = vst.msk [vmem:[#allocation2 + $0x38] sm:$0xff] %vm610_vm1, %v2430_v15  ;;  %618 = vst.msk [vmem:[#allocation2 + $0x40] sm:$0xff] %vm610_vm1, %v2431_v16  ;;  %v2433_v21 = vld [vmem:[%s2550_s16 + $0x48] sm:$0xff]   ;;  %v2434_v24 = vld [vmem:[%s2550_s16 + $0x50] sm:$0xff]  }
  0x16   : > { %619 = vst.msk [vmem:[#allocation2 + $0x48] sm:$0xff] %vm610_vm1, %v2432_v17  ;;  %620 = vst.msk [vmem:[#allocation2 + $0x50] sm:$0xff] %vm610_vm1, %v2433_v21  ;;  %v2435_v25 = vld [vmem:[%s2550_s16 + $0x58] sm:$0xff]   ;;  %v2436_v27 = vld [vmem:[%s2550_s16 + $0x60] sm:$0xff]  }
  0x17   : > { %621 = vst.msk [vmem:[#allocation2 + $0x58] sm:$0xff] %vm610_vm1, %v2434_v24  ;;  %622 = vst.msk [vmem:[#allocation2 + $0x60] sm:$0xff] %vm610_vm1, %v2435_v25  ;;  %v2437_v29 = vld [vmem:[%s2550_s16 + $0x68] sm:$0xff]   ;;  %v2438_v31 = vld [vmem:[%s2550_s16 + $0x70] sm:$0xff]  }
  0x18   : > { %623 = vst.msk [vmem:[#allocation2 + $0x68] sm:$0xff] %vm610_vm1, %v2436_v27  ;;  %624 = vst.msk [vmem:[#allocation2 + $0x70] sm:$0xff] %vm610_vm1, %v2437_v29  ;;  %v2439_v32 = vld [vmem:[%s2550_s16 + $0x78] sm:$0xff]   ;;  %v658_v36 = vld [vmem:[#allocation2] sm:$0xff] }
  0x19   : > { %v677_v18 = vld [vmem:[#allocation2 + $0x8] sm:$0xff]  ;;  %v920_v20 = vld [vmem:[#allocation2 + $0x10] sm:$0xff]  ;;  %625 = vst.msk [vmem:[#allocation2 + $0x78] sm:$0xff] %vm610_vm1, %v2438_v31  ;;  %626 = vst.msk [vmem:[#allocation2 + $0x80] sm:$0xff] %vm610_vm1, %v2439_v32 }
  0x1a   : > { %2217 = vmatprep.mubr.msk.bf16.mxu1 %vm610_vm1, %v677_v18  ;;  %2253 = vmatprep.mubr.msk.bf16.mxu0 %vm610_vm1, %v920_v20  ;;  %v921_v22 = vld [vmem:[#allocation2 + $0x18] sm:$0xff]  ;;  %v922_v23 = vld [vmem:[#allocation2 + $0x20] sm:$0xff]  ;;  %v935_v44 = vld [vmem:[#allocation2 + $0x88] sm:$0xff] }
  0x1b   : > { %2218 = vmatmul.mubr.msk.bf16.vlgmr.msra.gmra.mrb[0].mxu1 %vm610_vm1, %v920_v20  ;;  %2254 = vmatmul.mubr.msk.bf16.vlgmr.msra.gmra.mrb[0].mxu0 %vm610_vm1, %v921_v22  ;;  %v923_v28 = vld [vmem:[#allocation2 + $0x28] sm:$0xff]  ;;  %v924_v30 = vld [vmem:[#allocation2 + $0x30] sm:$0xff] }
  0x1c   : > { %2323 = vmatpush3.bf16.msra.mxu1 %v2419_v1  ;;  %2286 = vmatpush3.bf16.msra.mxu0 %v2424_v6  ;;  %v925_v33 = vld [vmem:[#allocation2 + $0x38] sm:$0xff]  ;;  %v926_v34 = vld [vmem:[#allocation2 + $0x40] sm:$0xff] }
  0x1d   : > { %2221 = vmatprep.mubr.msk.bf16.mxu1 %vm610_vm1, %v921_v22  ;;  %2257 = vmatprep.mubr.msk.bf16.mxu0 %vm610_vm1, %v922_v23  ;;  %v927_v35 = vld [vmem:[#allocation2 + $0x48] sm:$0xff]  ;;  %v686_v37 = vld [vmem:[#allocation2 + $0x50] sm:$0xff] }
  0x1e   : > { %2392 = vmatprep.subr.msk.bf16.mxu0 %vm754_vm0, %v2429_v19  ;;  %2391 = vmatprep.subr.msk.bf16.mxu1 %vm754_vm0, %v2421_v3  ;;  %v687_v38 = vld [vmem:[#allocation2 + $0x58] sm:$0xff]  ;;  %v688_v39 = vld [vmem:[#allocation2 + $0x60] sm:$0xff] }
  0x1f   : > { %v689_v40 = vld [vmem:[#allocation2 + $0x68] sm:$0xff]  ;;  %v690_v41 = vld [vmem:[#allocation2 + $0x70] sm:$0xff] }
  0x20   : > { %2324 = vmatpush3.bf16.msra.mxu1 %v998_v5  ;;  %2288 = vmatpush3.bf16.msra.mxu0 %v1219_v26  ;;  %v691_v42 = vld [vmem:[#allocation2 + $0x78] sm:$0xff]  ;;  %v692_v43 = vld [vmem:[#allocation2 + $0x80] sm:$0xff] }
  0x23   : > { %2222 = vmatmul.mubr.msk.bf16.gmra.mrb[4].mxu1 %vm610_vm1, %v922_v23  ;;  %2258 = vmatmul.mubr.msk.bf16.gmra.mrb[4].mxu0 %vm610_vm1, %v923_v28 }
  0x24   : > { %2225 = vmatprep.mubr.msk.bf16.mxu1 %vm610_vm1, %v923_v28  ;;  %2261 = vmatprep.mubr.msk.bf16.mxu0 %vm610_vm1, %v924_v30 }
  0x2b   : > { %2226 = vmatmul.mubr.msk.bf16.gmra.mrb[8].mxu1 %vm610_vm1, %v924_v30  ;;  %2262 = vmatmul.mubr.msk.bf16.gmra.mrb[8].mxu0 %vm610_vm1, %v925_v33 }
  0x2c   : > { %2229 = vmatprep.mubr.msk.bf16.mxu1 %vm610_vm1, %v925_v33  ;;  %2265 = vmatprep.mubr.msk.bf16.mxu0 %vm610_vm1, %v926_v34 }
  0x33   : > { %2230 = vmatmul.mubr.msk.bf16.gmra.mrb[12].mxu1 %vm610_vm1, %v926_v34  ;;  %2266 = vmatmul.mubr.msk.bf16.gmra.mrb[12].mxu0 %vm610_vm1, %v927_v35 }
  0x34   : > { %2233 = vmatprep.mubr.msk.bf16.mxu1 %vm610_vm1, %v927_v35  ;;  %2289 = vmatprep.mubr.msk.bf16.mxu0 %vm610_vm1, %v658_v36 }
  0x3b   : > { %2234 = vmatmul.mubr.msk.bf16.gmra.mrb[16].mxu1 %vm610_vm1, %v686_v37  ;;  %2290 = vmatmul.mubr.msk.bf16.vlgmr.msra.gmra.mrb[0].mxu0 %vm610_vm1, %v677_v18 }
  0x3c   : > { %2237 = vmatprep.mubr.msk.bf16.mxu1 %vm610_vm1, %v687_v38  ;;  %2293 = vmatprep.mubr.msk.bf16.mxu0 %vm610_vm1, %v920_v20 }
  0x43   : > { %2238 = vmatmul.mubr.msk.bf16.gmra.mrb[20].mxu1 %vm610_vm1, %v688_v39  ;;  %2294 = vmatmul.mubr.msk.bf16.gmra.mrb[4].mxu0 %vm610_vm1, %v921_v22 }
  0x44   : > { %2241 = vmatprep.mubr.msk.bf16.mxu1 %vm610_vm1, %v689_v40  ;;  %2297 = vmatprep.mubr.msk.bf16.mxu0 %vm610_vm1, %v922_v23 }
  0x4b   : > { %2242 = vmatmul.mubr.msk.bf16.gmra.mrb[24].mxu1 %vm610_vm1, %v690_v41  ;;  %2298 = vmatmul.mubr.msk.bf16.gmra.mrb[8].mxu0 %vm610_vm1, %v923_v28 }
  0x4c   : > { %2245 = vmatprep.mubr.msk.bf16.mxu1 %vm610_vm1, %v691_v42  ;;  %2301 = vmatprep.mubr.msk.bf16.mxu0 %vm610_vm1, %v924_v30 }
  0x53   : > { %2246 = vmatmul.mubr.msk.bf16.gmra.mrb[28].mxu1 %vm610_vm1, %v692_v43  ;;  %2302 = vmatmul.mubr.msk.bf16.gmra.mrb[12].mxu0 %vm610_vm1, %v925_v33 }
  0x54   : > { %2269 = vmatprep.mubr.msk.bf16.mxu1 %vm610_vm1, %v686_v37  ;;  %2305 = vmatprep.mubr.msk.bf16.mxu0 %vm610_vm1, %v926_v34 }
  0x5b   : > { %2270 = vmatmul.mubr.msk.bf16.vlgmr.msra.gmra.mrb[16].mxu1 %vm610_vm1, %v687_v38  ;;  %2306 = vmatmul.mubr.msk.bf16.gmra.mrb[16].mxu0 %vm610_vm1, %v927_v35 }
  0x5c   : > { %2273 = vmatprep.mubr.msk.bf16.mxu1 %vm610_vm1, %v688_v39  ;;  %2309 = vmatprep.mubr.msk.bf16.mxu0 %vm610_vm1, %v686_v37 }
  0x63   : > { %2274 = vmatmul.mubr.msk.bf16.gmra.mrb[20].mxu1 %vm610_vm1, %v689_v40  ;;  %2310 = vmatmul.mubr.msk.bf16.gmra.mrb[20].mxu0 %vm610_vm1, %v687_v38 }
  0x64   : > { %2277 = vmatprep.mubr.msk.bf16.mxu1 %vm610_vm1, %v690_v41  ;;  %2313 = vmatprep.mubr.msk.bf16.mxu0 %vm610_vm1, %v688_v39 }
  0x6b   : > { %2278 = vmatmul.mubr.msk.bf16.gmra.mrb[24].mxu1 %vm610_vm1, %v691_v42  ;;  %2314 = vmatmul.mubr.msk.bf16.gmra.mrb[24].mxu0 %vm610_vm1, %v689_v40 }
  0x6c   : > { %2281 = vmatprep.mubr.msk.bf16.mxu1 %vm610_vm1, %v692_v43  ;;  %2317 = vmatprep.mubr.msk.bf16.mxu0 %vm610_vm1, %v690_v41 }
  0x73   : > { %2282 = vmatmul.mubr.msk.bf16.gmra.mrb[28].mxu1 %vm610_vm1, %v935_v44  ;;  %2318 = vmatmul.mubr.msk.bf16.gmra.mrb[28].mxu0 %vm610_vm1, %v691_v42 }
  0xee   : > { %v2219_v45 = vpop.f32.mrb[0].mxu1 }
  0xef   : > { %v792_v46 = vpop.f32.mrb[1].mxu1 }
  0xf0   : > { %v2220_v47 = vpop.f32.mrb[2].mxu1 }
  0xf1   : > { %v795_v48 = vpop.f32.mrb[3].mxu1 }
  0xf6   : > { %v2223_v49 = vpop.f32.mrb[4].mxu1 }
  0xf7   : > { %v808_v50 = vpop.f32.mrb[5].mxu1 }
  0xf8   : > { %v2224_v51 = vpop.f32.mrb[6].mxu1 }
  0xf9   : > { %v811_v52 = vpop.f32.mrb[7].mxu1 }
  0xfe   : > { %v2640_v53 = vpop.f32.mrb[8].mxu1 }
  0xff   : > { %v2642_v54 = vpop.f32.mrb[9].mxu1 }
 0x100   : > { %v2644_v55 = vpop.f32.mrb[10].mxu1 }
 0x101   : > { %v2646_v56 = vpop.f32.mrb[11].mxu1 }
 0x106   : > { %v2648_v57 = vpop.f32.mrb[12].mxu1 }
 0x107   : > { %v2650_v58 = vpop.f32.mrb[13].mxu1 }
 0x108   : > { %v2652_v59 = vpop.f32.mrb[14].mxu1 }
 0x109   : > { %v2654_v60 = vpop.f32.mrb[15].mxu1 }
 0x10e   : > { %v2291_v61 = vpop.f32.mrb[0].mxu0 }
 0x10f   : > { %v1264_v63 = vadd.f32 %v2291_v61, %v2219_v45  ;;  %v1255_v0 = vpop.f32.mrb[1].mxu0 }
 0x110   : > { %v1256_v1 = vadd.f32 %v1255_v0, %v792_v46  ;;  %v2292_v2 = vpop.f32.mrb[2].mxu0 }
 0x111   : > { %v1423_v3 = vadd.f32 %v2659_v62, %v1264_v63  ;;  %v1267_v4 = vadd.f32 %v2292_v2, %v2220_v47  ;;  %v1258_v5 = vpop.f32.mrb[3].mxu0 }
 0x112   : > { %v1421_v6 = vadd.f32 %v2659_v62, %v1256_v1  ;;  %v1259_v7 = vadd.f32 %v1258_v5, %v795_v48 }
 0x113   : > { %v2129_v8 = vpack.c.bf16 %v1423_v3, %v1423_v3  ;;  %v1424_v9 = vadd.f32 %v2659_v62, %v1267_v4  ;;  %v1688_v13 = vmul.f32 %v1423_v3, %v1423_v3  ;;  %v1618_v24 = vsel %vm1614_vm3, %v1423_v3, 0.0 }
 0x114   : > { %v2127_v10 = vpack.c.bf16 %v1421_v6, %v1421_v6  ;;  %v1686_v11 = vmul.f32 %v1421_v6, %v1421_v6  ;;  %v1422_v12 = vadd.f32 %v2659_v62, %v1259_v7  ;;  %v1615_v15 = vsel %vm1614_vm3, %v1421_v6, 0.0 }
 0x115   : > { %1584 = vst.msk [vmem:[%s2667_s23 + $0x8] sm:$0xf] %vm1581_vm2, %v2129_v8  ;;  %v2130_v14 = vpack.c.bf16 %v1424_v9, %v1424_v9  ;;  %v1689_v20 = vmul.f32 %v1424_v9, %v1424_v9  ;;  %v1721_v34 = vsel %vm1614_vm3, %v1688_v13, 0.0  ;;  %v1620_v37 = vsel %vm1614_vm3, %v1424_v9, 0.0 }
 0x116   : > { %1582 = vst.msk [vmem:[%s2667_s23] sm:$0xf] %vm1581_vm2, %v2127_v10  ;;  %v2128_v16 = vpack.c.bf16 %v1422_v12, %v1422_v12  ;;  %v1616_v17 = vsel %vm1614_vm3, %v1422_v12, 0.0  ;;  %v1687_v18 = vmul.f32 %v1422_v12, %v1422_v12  ;;  %v2295_v19 = vpop.f32.mrb[4].mxu0  ;;  %v1718_v25 = vsel %vm1614_vm3, %v1686_v11, 0.0 }
 0x117   : > { %1585 = vst.msk [vmem:[%s2667_s23 + $0xc] sm:$0xf] %vm1581_vm2, %v2130_v14  ;;  %v1617_v21 = vadd.f32 %v1616_v17, %v1615_v15  ;;  %v1280_v22 = vadd.f32 %v2295_v19, %v2223_v49  ;;  %v1271_v23 = vpop.f32.mrb[5].mxu0  ;;  %v1723_v38 = vsel %vm1614_vm3, %v1689_v20, 0.0 }
 0x118   : > { %1583 = vst.msk [vmem:[%s2667_s23 + $0x4] sm:$0xf] %vm1581_vm2, %v2128_v16  ;;  %v1719_v26 = vsel %vm1614_vm3, %v1687_v18, 0.0  ;;  %v1272_v27 = vadd.f32 %v1271_v23, %v808_v50  ;;  %v2296_v28 = vpop.f32.mrb[6].mxu0 }
 0x119   : > { %v1619_v29 = vadd.f32 %v1618_v24, %v1617_v21  ;;  %v1720_v30 = vadd.f32 %v1719_v26, %v1718_v25  ;;  %v1427_v31 = vadd.f32 %v2659_v62, %v1280_v22  ;;  %v1283_v32 = vadd.f32 %v2296_v28, %v2224_v51  ;;  %v1274_v33 = vpop.f32.mrb[7].mxu0 }
 0x11a   : > { %v1425_v35 = vadd.f32 %v2659_v62, %v1272_v27  ;;  %v1275_v36 = vadd.f32 %v1274_v33, %v811_v52 }
 0x11b   : > { %v1722_v39 = vadd.f32 %v1721_v34, %v1720_v30  ;;  %v2133_v40 = vpack.c.bf16 %v1427_v31, %v1427_v31  ;;  %v1621_v42 = vadd.f32 %v1620_v37, %v1619_v29  ;;  %v1428_v46 = vadd.f32 %v2659_v62, %v1283_v32 }
 0x11c   : > { %v2131_v41 = vpack.c.bf16 %v1425_v35, %v1425_v35  ;;  %v1622_v43 = vsel %vm1614_vm3, %v1425_v35, 0.0  ;;  %v1690_v44 = vmul.f32 %v1425_v35, %v1425_v35  ;;  %v1426_v47 = vadd.f32 %v2659_v62, %v1275_v36 }
 0x11d   : > { %1588 = vst.msk [vmem:[%s2667_s23 + $0x18] sm:$0xf] %vm1581_vm2, %v2133_v40  ;;  %v1724_v45 = vadd.f32 %v1723_v38, %v1722_v39  ;;  %v1623_v48 = vadd.f32 %v1622_v43, %v1621_v42  ;;  %v1692_v51 = vmul.f32 %v1427_v31, %v1427_v31  ;;  %v2134_v61 = vpack.c.bf16 %v1428_v46, %v1428_v46 }
 0x11e   : > { %1586 = vst.msk [vmem:[%s2667_s23 + $0x10] sm:$0xf] %vm1581_vm2, %v2131_v41  ;;  %v1725_v49 = vsel %vm1614_vm3, %v1690_v44, 0.0  ;;  %v2299_v50 = vpop.f32.mrb[8].mxu0  ;;  %v2132_v0 = vpack.c.bf16 %v1426_v47, %v1426_v47  ;;  %v1624_v1 = vsel %vm1614_vm3, %v1426_v47, 0.0  ;;  %v1691_v2 = vmul.f32 %v1426_v47, %v1426_v47 }
 0x11f   : > { %v1726_v52 = vadd.f32 %v1725_v49, %v1724_v45  ;;  %v1287_v63 = vpop.f32.mrb[9].mxu0  ;;  %v1296_v3 = vadd.f32 %v2299_v50, %v2640_v53  ;;  %v1626_v5 = vsel %vm1614_vm3, %v1427_v31, 0.0  ;;  %1589 = vst.msk [vmem:[%s2667_s23 + $0x1c] sm:$0xf] %vm1581_vm2, %v2134_v61  ;;  %v1625_v6 = vadd.f32 %v1624_v1, %v1623_v48 }
 0x120   : > { %v2300_v4 = vpop.f32.mrb[10].mxu0  ;;  %v1288_v7 = vadd.f32 %v1287_v63, %v2642_v54  ;;  %v1693_v10 = vmul.f32 %v1428_v46, %v1428_v46  ;;  %1587 = vst.msk [vmem:[%s2667_s23 + $0x14] sm:$0xf] %vm1581_vm2, %v2132_v0  ;;  %v1727_v11 = vsel %vm1614_vm3, %v1691_v2, 0.0  ;;  %v1729_v54 = vsel %vm1614_vm3, %v1692_v51, 0.0 }
 0x121   : > { %v1299_v8 = vadd.f32 %v2300_v4, %v2644_v55  ;;  %v1290_v9 = vpop.f32.mrb[11].mxu0  ;;  %v1431_v12 = vadd.f32 %v2659_v62, %v1296_v3  ;;  %v1627_v13 = vadd.f32 %v1626_v5, %v1625_v6  ;;  %v1728_v14 = vadd.f32 %v1727_v11, %v1726_v52 }
 0x122   : > { %v1291_v53 = vadd.f32 %v1290_v9, %v2646_v56  ;;  %v1429_v15 = vadd.f32 %v2659_v62, %v1288_v7  ;;  %v1628_v55 = vsel %vm1614_vm3, %v1428_v46, 0.0  ;;  %v1731_v22 = vsel %vm1614_vm3, %v1693_v10, 0.0 }
 0x123   : > { %v1432_v16 = vadd.f32 %v2659_v62, %v1299_v8  ;;  %v2137_v17 = vpack.c.bf16 %v1431_v12, %v1431_v12  ;;  %v1730_v19 = vadd.f32 %v1729_v54, %v1728_v14  ;;  %v1629_v21 = vadd.f32 %v1628_v55, %v1627_v13 }
 0x124   : > { %v1430_v18 = vadd.f32 %v2659_v62, %v1291_v53  ;;  %v2135_v20 = vpack.c.bf16 %v1429_v15, %v1429_v15  ;;  %v1630_v56 = vsel %vm1614_vm3, %v1429_v15, 0.0  ;;  %v1634_v23 = vsel %vm1614_vm3, %v1431_v12, 0.0 }
 0x125   : > { %1592 = vst.msk [vmem:[%s2667_s23 + $0x28] sm:$0xf] %vm1581_vm2, %v2137_v17  ;;  %v1694_v24 = vmul.f32 %v1429_v15, %v1429_v15  ;;  %v2138_v25 = vpack.c.bf16 %v1432_v16, %v1432_v16  ;;  %v1696_v27 = vmul.f32 %v1431_v12, %v1431_v12  ;;  %v1631_v28 = vadd.f32 %v1630_v56, %v1629_v21 }
 0x126   : > { %v2303_v26 = vpop.f32.mrb[12].mxu0  ;;  %1590 = vst.msk [vmem:[%s2667_s23 + $0x20] sm:$0xf] %vm1581_vm2, %v2135_v20  ;;  %v1732_v29 = vadd.f32 %v1731_v22, %v1730_v19  ;;  %v2136_v30 = vpack.c.bf16 %v1430_v18, %v1430_v18  ;;  %v1632_v33 = vsel %vm1614_vm3, %v1430_v18, 0.0  ;;  %v1695_v34 = vmul.f32 %v1430_v18, %v1430_v18 }
 0x127   : > { %v1303_v31 = vpop.f32.mrb[13].mxu0  ;;  %v1733_v32 = vsel %vm1614_vm3, %v1694_v24, 0.0  ;;  %1593 = vst.msk [vmem:[%s2667_s23 + $0x2c] sm:$0xf] %vm1581_vm2, %v2138_v25  ;;  %v1312_v35 = vadd.f32 %v2303_v26, %v2648_v57  ;;  %v1697_v38 = vmul.f32 %v1432_v16, %v1432_v16  ;;  %v1633_v39 = vadd.f32 %v1632_v33, %v1631_v28 }
 0x128   : > { %v2304_v36 = vpop.f32.mrb[14].mxu0  ;;  %v1734_v37 = vadd.f32 %v1733_v32, %v1732_v29  ;;  %1591 = vst.msk [vmem:[%s2667_s23 + $0x24] sm:$0xf] %vm1581_vm2, %v2136_v30  ;;  %v1304_v40 = vadd.f32 %v1303_v31, %v2650_v58  ;;  %v1735_v42 = vsel %vm1614_vm3, %v1695_v34, 0.0  ;;  %v1737_v48 = vsel %vm1614_vm3, %v1696_v27, 0.0 }
 0x129   : > { %v1306_v41 = vpop.f32.mrb[15].mxu0  ;;  %v1435_v43 = vadd.f32 %v2659_v62, %v1312_v35  ;;  %v1315_v44 = vadd.f32 %v2304_v36, %v2652_v59  ;;  %v1635_v46 = vadd.f32 %v1634_v23, %v1633_v39  ;;  %v1636_v49 = vsel %vm1614_vm3, %v1432_v16, 0.0 }
 0x12a   : > { %v1307_v45 = vadd.f32 %v1306_v41, %v2654_v60  ;;  %v1736_v57 = vadd.f32 %v1735_v42, %v1734_v37  ;;  %v1433_v47 = vadd.f32 %v2659_v62, %v1304_v40  ;;  %v1739_v60 = vsel %vm1614_vm3, %v1697_v38, 0.0 }
 0x12b   : > { %v2141_v58 = vpack.c.bf16 %v1435_v43, %v1435_v43  ;;  %v1436_v50 = vadd.f32 %v2659_v62, %v1315_v44  ;;  %v1637_v61 = vadd.f32 %v1636_v49, %v1635_v46  ;;  %v1700_v9 = vmul.f32 %v1435_v43, %v1435_v43 }
 0x12c   : > { %v1738_v51 = vadd.f32 %v1737_v48, %v1736_v57  ;;  %v2139_v52 = vpack.c.bf16 %v1433_v47, %v1433_v47  ;;  %v1638_v63 = vsel %vm1614_vm3, %v1433_v47, 0.0  ;;  %v1698_v0 = vmul.f32 %v1433_v47, %v1433_v47 }
 0x12d   : > { %1596 = vst.msk [vmem:[%s2667_s23 + $0x38] sm:$0xf] %vm1581_vm2, %v2141_v58  ;;  %v2142_v1 = vpack.c.bf16 %v1436_v50, %v1436_v50  ;;  %v1639_v4 = vadd.f32 %v1638_v63, %v1637_v61  ;;  %v1434_v6 = vadd.f32 %v2659_v62, %v1307_v45  ;;  %v1642_v20 = vsel %vm1614_vm3, %v1435_v43, 0.0 }
 0x12e   : > { %v2271_v59 = vpop.f32.mrb[16].mxu1  ;;  %v2307_v2 = vpop.f32.mrb[16].mxu0  ;;  %1594 = vst.msk [vmem:[%s2667_s23 + $0x30] sm:$0xf] %vm1581_vm2, %v2139_v52  ;;  %v1740_v5 = vadd.f32 %v1739_v60, %v1738_v51  ;;  %v1741_v10 = vsel %vm1614_vm3, %v1698_v0, 0.0  ;;  %v1701_v21 = vmul.f32 %v1436_v50, %v1436_v50  ;;  %v1745_v23 = vsel %vm1614_vm3, %v1700_v9, 0.0 }
 0x12f   : > { %v1098_v3 = vpop.f32.mrb[17].mxu1  ;;  %v1319_v7 = vpop.f32.mrb[17].mxu0  ;;  %1597 = vst.msk [vmem:[%s2667_s23 + $0x3c] sm:$0xf] %vm1581_vm2, %v2142_v1  ;;  %v2341_v11 = vadd.f32 %v2307_v2, %v2271_v59  ;;  %v2140_v15 = vpack.c.bf16 %v1434_v6, %v1434_v6  ;;  %v1640_v16 = vsel %vm1614_vm3, %v1434_v6, 0.0  ;;  %v1699_v17 = vmul.f32 %v1434_v6, %v1434_v6 }
 0x130   : > { %v2272_v8 = vpop.f32.mrb[18].mxu1  ;;  %v2342_v12 = vadd.f32 %v1319_v7, %v1098_v3  ;;  %v2308_v53 = vpop.f32.mrb[18].mxu0  ;;  %v1742_v14 = vadd.f32 %v1741_v10, %v1740_v5  ;;  %v1641_v55 = vadd.f32 %v1640_v16, %v1639_v4  ;;  %v1644_v27 = vsel %vm1614_vm3, %v1436_v50, 0.0 }
 0x131   : > { %v1101_v13 = vpop.f32.mrb[19].mxu1  ;;  %v1322_v54 = vpop.f32.mrb[19].mxu0  ;;  %v1439_v18 = vadd.f32 %v2341_v11, %v2659_v62  ;;  %1595 = vst.msk [vmem:[%s2667_s23 + $0x34] sm:$0xf] %vm1581_vm2, %v2140_v15  ;;  %v2343_v56 = vadd.f32 %v2308_v53, %v2272_v8  ;;  %v1743_v25 = vsel %vm1614_vm3, %v1699_v17, 0.0  ;;  %v1747_v38 = vsel %vm1614_vm3, %v1701_v21, 0.0 }
 0x132   : > { %v1437_v19 = vadd.f32 %v2342_v12, %v2659_v62  ;;  %v2344_v22 = vadd.f32 %v1322_v54, %v1101_v13  ;;  %v1643_v24 = vadd.f32 %v1642_v20, %v1641_v55  ;;  %v1744_v28 = vadd.f32 %v1743_v25, %v1742_v14 }
 0x133   : > { %v2145_v26 = vpack.c.bf16 %v1439_v18, %v1439_v18  ;;  %v1440_v34 = vadd.f32 %v2343_v56, %v2659_v62  ;;  %v1650_v43 = vsel %vm1614_vm3, %v1439_v18, 0.0  ;;  %v1704_v48 = vmul.f32 %v1439_v18, %v1439_v18 }
 0x134   : > { %v2143_v29 = vpack.c.bf16 %v1437_v19, %v1437_v19  ;;  %v1646_v30 = vsel %vm1614_vm3, %v1437_v19, 0.0  ;;  %v1645_v32 = vadd.f32 %v1644_v27, %v1643_v24  ;;  %v1702_v33 = vmul.f32 %v1437_v19, %v1437_v19 }
 0x135   : > { %1600 = vst.msk [vmem:[%s2667_s23 + $0x48] sm:$0xf] %vm1581_vm2, %v2145_v26  ;;  %v1438_v35 = vadd.f32 %v2344_v22, %v2659_v62  ;;  %v1746_v39 = vadd.f32 %v1745_v23, %v1744_v28  ;;  %v2146_v46 = vpack.c.bf16 %v1440_v34, %v1440_v34  ;;  %v1705_v0 = vmul.f32 %v1440_v34, %v1440_v34 }
 0x136   : > { %v2275_v31 = vpop.f32.mrb[20].mxu1  ;;  %v2311_v36 = vpop.f32.mrb[20].mxu0  ;;  %1598 = vst.msk [vmem:[%s2667_s23 + $0x40] sm:$0xf] %vm1581_vm2, %v2143_v29  ;;  %v1647_v44 = vadd.f32 %v1646_v30, %v1645_v32  ;;  %v1749_v45 = vsel %vm1614_vm3, %v1702_v33, 0.0  ;;  %v1652_v6 = vsel %vm1614_vm3, %v1440_v34, 0.0 }
 0x137   : > { %v1114_v37 = vpop.f32.mrb[21].mxu1  ;;  %v2345_v40 = vadd.f32 %v2311_v36, %v2275_v31  ;;  %v1335_v41 = vpop.f32.mrb[21].mxu0  ;;  %v1748_v49 = vadd.f32 %v1747_v38, %v1746_v39  ;;  %v2144_v58 = vpack.c.bf16 %v1438_v35, %v1438_v35  ;;  %v1648_v50 = vsel %vm1614_vm3, %v1438_v35, 0.0  ;;  %1601 = vst.msk [vmem:[%s2667_s23 + $0x4c] sm:$0xf] %vm1581_vm2, %v2146_v46 }
 0x138   : > { %v2276_v42 = vpop.f32.mrb[22].mxu1  ;;  %v2312_v57 = vpop.f32.mrb[22].mxu0  ;;  %v1649_v52 = vadd.f32 %v1648_v50, %v1647_v44  ;;  %v1703_v61 = vmul.f32 %v1438_v35, %v1438_v35  ;;  %v2346_v59 = vadd.f32 %v1335_v41, %v1114_v37  ;;  %v1753_v11 = vsel %vm1614_vm3, %v1704_v48, 0.0 }
 0x139   : > { %v1117_v47 = vpop.f32.mrb[23].mxu1  ;;  %v1338_v51 = vpop.f32.mrb[23].mxu0  ;;  %v1443_v63 = vadd.f32 %v2345_v40, %v2659_v62  ;;  %v1750_v60 = vadd.f32 %v1749_v45, %v1748_v49  ;;  %1599 = vst.msk [vmem:[%s2667_s23 + $0x44] sm:$0xf] %vm1581_vm2, %v2144_v58  ;;  %v2347_v1 = vadd.f32 %v2312_v57, %v2276_v42  ;;  %v1755_v15 = vsel %vm1614_vm3, %v1705_v0, 0.0 }
 0x13a   : > { %v2348_v2 = vadd.f32 %v1338_v51, %v1117_v47  ;;  %v1651_v3 = vadd.f32 %v1650_v43, %v1649_v52  ;;  %v1751_v4 = vsel %vm1614_vm3, %v1703_v61, 0.0  ;;  %v1441_v8 = vadd.f32 %v2346_v59, %v2659_v62 }
 0x13b   : > { %v2149_v5 = vpack.c.bf16 %v1443_v63, %v1443_v63  ;;  %v1752_v7 = vadd.f32 %v1751_v4, %v1750_v60  ;;  %v1444_v9 = vadd.f32 %v2347_v1, %v2659_v62  ;;  %v1658_v19 = vsel %vm1614_vm3, %v1443_v63, 0.0 }
 0x13c   : > { %v1653_v12 = vadd.f32 %v1652_v6, %v1651_v3  ;;  %v1442_v53 = vadd.f32 %v2348_v2, %v2659_v62  ;;  %v2147_v54 = vpack.c.bf16 %v1441_v8, %v1441_v8  ;;  %v1654_v55 = vsel %vm1614_vm3, %v1441_v8, 0.0 }
 0x13d   : > { %1604 = vst.msk [vmem:[%s2667_s23 + $0x58] sm:$0xf] %vm1581_vm2, %v2149_v5  ;;  %v1754_v16 = vadd.f32 %v1753_v11, %v1752_v7  ;;  %v1706_v21 = vmul.f32 %v1441_v8, %v1441_v8  ;;  %v2150_v56 = vpack.c.bf16 %v1444_v9, %v1444_v9  ;;  %v1708_v24 = vmul.f32 %v1443_v63, %v1443_v63 }
 0x13e   : > { %v2279_v10 = vpop.f32.mrb[24].mxu1  ;;  %v2315_v13 = vpop.f32.mrb[24].mxu0  ;;  %v1655_v20 = vadd.f32 %v1654_v55, %v1653_v12  ;;  %1602 = vst.msk [vmem:[%s2667_s23 + $0x50] sm:$0xf] %vm1581_vm2, %v2147_v54  ;;  %v2148_v26 = vpack.c.bf16 %v1442_v53, %v1442_v53  ;;  %v1656_v27 = vsel %vm1614_vm3, %v1442_v53, 0.0  ;;  %v1707_v31 = vmul.f32 %v1442_v53, %v1442_v53 }
 0x13f   : > { %v1130_v14 = vpop.f32.mrb[25].mxu1  ;;  %v1351_v17 = vpop.f32.mrb[25].mxu0  ;;  %v1756_v25 = vadd.f32 %v1755_v15, %v1754_v16  ;;  %v1757_v29 = vsel %vm1614_vm3, %v1706_v21, 0.0  ;;  %1605 = vst.msk [vmem:[%s2667_s23 + $0x5c] sm:$0xf] %vm1581_vm2, %v2150_v56  ;;  %v2349_v32 = vadd.f32 %v2315_v13, %v2279_v10  ;;  %v1709_v34 = vmul.f32 %v1444_v9, %v1444_v9 }
 0x140   : > { %v2280_v18 = vpop.f32.mrb[26].mxu1  ;;  %v2316_v22 = vpop.f32.mrb[26].mxu0  ;;  %v1657_v30 = vadd.f32 %v1656_v27, %v1655_v20  ;;  %1603 = vst.msk [vmem:[%s2667_s23 + $0x54] sm:$0xf] %vm1581_vm2, %v2148_v26  ;;  %v2350_v35 = vadd.f32 %v1351_v17, %v1130_v14  ;;  %v1759_v38 = vsel %vm1614_vm3, %v1707_v31, 0.0  ;;  %v1660_v41 = vsel %vm1614_vm3, %v1444_v9, 0.0 }
 0x141   : > { %v1133_v23 = vpop.f32.mrb[27].mxu1  ;;  %v1354_v28 = vpop.f32.mrb[27].mxu0  ;;  %v1758_v33 = vadd.f32 %v1757_v29, %v1756_v25  ;;  %v2351_v36 = vadd.f32 %v2316_v22, %v2280_v18  ;;  %v1447_v39 = vadd.f32 %v2349_v32, %v2659_v62  ;;  %v1761_v46 = vsel %vm1614_vm3, %v1708_v24, 0.0 }
 0x142   : > { %v1659_v37 = vadd.f32 %v1658_v19, %v1657_v30  ;;  %v2352_v40 = vadd.f32 %v1354_v28, %v1133_v23  ;;  %v1445_v43 = vadd.f32 %v2350_v35, %v2659_v62  ;;  %v1763_v59 = vsel %vm1614_vm3, %v1709_v34, 0.0 }
 0x143   : > { %v1760_v42 = vadd.f32 %v1759_v38, %v1758_v33  ;;  %v1448_v44 = vadd.f32 %v2351_v36, %v2659_v62  ;;  %v2153_v57 = vpack.c.bf16 %v1447_v39, %v1447_v39  ;;  %v1712_v11 = vmul.f32 %v1447_v39, %v1447_v39 }
 0x144   : > { %v1661_v47 = vadd.f32 %v1660_v41, %v1659_v37  ;;  %v2151_v50 = vpack.c.bf16 %v1445_v43, %v1445_v43  ;;  %v1662_v51 = vsel %vm1614_vm3, %v1445_v43, 0.0  ;;  %v1710_v52 = vmul.f32 %v1445_v43, %v1445_v43 }
 0x145   : > { %v1762_v58 = vadd.f32 %v1761_v46, %v1760_v42  ;;  %1608 = vst.msk [vmem:[%s2667_s23 + $0x68] sm:$0xf] %vm1581_vm2, %v2153_v57  ;;  %v2154_v0 = vpack.c.bf16 %v1448_v44, %v1448_v44  ;;  %v1446_v5 = vadd.f32 %v2352_v40, %v2659_v62  ;;  %v1666_v55 = vsel %vm1614_vm3, %v1447_v39, 0.0 }
 0x146   : > { %v2283_v45 = vpop.f32.mrb[28].mxu1  ;;  %v2319_v48 = vpop.f32.mrb[28].mxu0  ;;  %v1663_v60 = vadd.f32 %v1662_v51, %v1661_v47  ;;  %1606 = vst.msk [vmem:[%s2667_s23 + $0x60] sm:$0xf] %vm1581_vm2, %v2151_v50  ;;  %v1765_v4 = vsel %vm1614_vm3, %v1710_v52, 0.0  ;;  %v1713_v17 = vmul.f32 %v1448_v44, %v1448_v44  ;;  %v1668_v22 = vsel %vm1614_vm3, %v1448_v44, 0.0 }
 0x147   : > { %v1146_v49 = vpop.f32.mrb[29].mxu1  ;;  %v1367_v61 = vpop.f32.mrb[29].mxu0  ;;  %v1764_v3 = vadd.f32 %v1763_v59, %v1762_v58  ;;  %1609 = vst.msk [vmem:[%s2667_s23 + $0x6c] sm:$0xf] %vm1581_vm2, %v2154_v0  ;;  %v2353_v7 = vadd.f32 %v2319_v48, %v2283_v45  ;;  %v2152_v53 = vpack.c.bf16 %v1446_v5, %v1446_v5  ;;  %v1664_v13 = vsel %vm1614_vm3, %v1446_v5, 0.0 }
 0x148   : > { %v2284_v63 = vpop.f32.mrb[30].mxu1  ;;  %v2320_v1 = vpop.f32.mrb[30].mxu0  ;;  %v2354_v8 = vadd.f32 %v1367_v61, %v1146_v49  ;;  %v1665_v14 = vadd.f32 %v1664_v13, %v1663_v60  ;;  %v1711_v15 = vmul.f32 %v1446_v5, %v1446_v5  ;;  %v1769_v26 = vsel %vm1614_vm3, %v1712_v11, 0.0 }
 0x149   : > { %v1149_v2 = vpop.f32.mrb[31].mxu1  ;;  %v1370_v6 = vpop.f32.mrb[31].mxu0  ;;  %v2355_v9 = vadd.f32 %v2320_v1, %v2284_v63  ;;  %v1766_v12 = vadd.f32 %v1765_v4, %v1764_v3  ;;  %v1451_v16 = vadd.f32 %v2353_v7, %v2659_v62  ;;  %1607 = vst.msk [vmem:[%s2667_s23 + $0x64] sm:$0xf] %vm1581_vm2, %v2152_v53 }
 0x14a   : > { %v2356_v10 = vadd.f32 %v1370_v6, %v1149_v2  ;;  %v1449_v54 = vadd.f32 %v2354_v8, %v2659_v62  ;;  %v1667_v20 = vadd.f32 %v1666_v55, %v1665_v14  ;;  %v1767_v21 = vsel %vm1614_vm3, %v1711_v15, 0.0 }
 0x14b   : > { %v1452_v18 = vadd.f32 %v2355_v9, %v2659_v62  ;;  %v2157_v56 = vpack.c.bf16 %v1451_v16, %v1451_v16  ;;  %v1768_v23 = vadd.f32 %v1767_v21, %v1766_v12  ;;  %v1716_v37 = vmul.f32 %v1451_v16, %v1451_v16 }
 0x14c   : > { %v1450_v19 = vadd.f32 %v2356_v10, %v2659_v62  ;;  %v2155_v24 = vpack.c.bf16 %v1449_v54, %v1449_v54  ;;  %v1670_v25 = vsel %vm1614_vm3, %v1449_v54, 0.0  ;;  %v1669_v27 = vadd.f32 %v1668_v22, %v1667_v20 }
 0x14d   : > { %1612 = vst.msk [vmem:[%s2667_s23 + $0x78] sm:$0xf] %vm1581_vm2, %v2157_v56  ;;  %v1714_v28 = vmul.f32 %v1449_v54, %v1449_v54  ;;  %v2158_v29 = vpack.c.bf16 %v1452_v18, %v1452_v18  ;;  %v1771_v62 = vsel %vm1614_vm3, %v1713_v17, 0.0  ;;  %v1770_v30 = vadd.f32 %v1769_v26, %v1768_v23 }
 0x14e   : > { %1610 = vst.msk [vmem:[%s2667_s23 + $0x70] sm:$0xf] %vm1581_vm2, %v2155_v24  ;;  %v2156_v31 = vpack.c.bf16 %v1450_v19, %v1450_v19  ;;  %v1671_v32 = vadd.f32 %v1670_v25, %v1669_v27  ;;  %v1672_v34 = vsel %vm1614_vm3, %v1450_v19, 0.0  ;;  %v1715_v35 = vmul.f32 %v1450_v19, %v1450_v19 }
 0x14f   : > { %v1773_v33 = vsel %vm1614_vm3, %v1714_v28, 0.0  ;;  %1613 = vst.msk [vmem:[%s2667_s23 + $0x7c] sm:$0xf] %vm1581_vm2, %v2158_v29  ;;  %v1772_v36 = vadd.f32 %v1771_v62, %v1770_v30  ;;  %v1674_v40 = vsel %vm1614_vm3, %v1451_v16, 0.0  ;;  %v1717_v42 = vmul.f32 %v1452_v18, %v1452_v18 }
 0x150   : > { %1611 = vst.msk [vmem:[%s2667_s23 + $0x74] sm:$0xf] %vm1581_vm2, %v2156_v31  ;;  %v1673_v38 = vadd.f32 %v1672_v34, %v1671_v32  ;;  %v1775_v39 = vsel %vm1614_vm3, %v1715_v35, 0.0  ;;  %v1676_v44 = vsel %vm1614_vm3, %v1452_v18, 0.0  ;;  %v1777_v46 = vsel %vm1614_vm3, %v1716_v37, 0.0 }
 0x151   : > { %v1774_v41 = vadd.f32 %v1773_v33, %v1772_v36  ;;  %v1779_v48 = vsel %vm1614_vm3, %v1717_v42, 0.0 }
 0x152   : > { %v1675_v43 = vadd.f32 %v1674_v40, %v1673_v38 }
 0x153   : > { %v1776_v45 = vadd.f32 %v1775_v39, %v1774_v41 }
 0x154   : > { %v1677_v57 = vadd.f32 %v1676_v44, %v1675_v43 }
 0x155   : > { %v1778_v47 = vadd.f32 %v1777_v46, %v1776_v45 }
 0x156   : > { %v1678_v49 = vrot.slane %v1677_v57, 4 }
 0x157   : > { %v1780_v58 = vadd.f32 %v1779_v48, %v1778_v47 }
 0x158   : > { %v1679_v50 = vadd.f32 %v1678_v49, %v1677_v57 }
 0x159   : > { %v1781_v51 = vrot.slane %v1780_v58, 4 }
 0x15a   : > { %v1680_v52 = vrot.slane %v1679_v50, 2 }
 0x15b   : > { %v1782_v61 = vadd.f32 %v1781_v51, %v1780_v58 }
 0x15c   : > { %v1681_v63 = vadd.f32 %v1680_v52, %v1679_v50 }
 0x15d   : > { %v1783_v59 = vrot.slane %v1782_v61, 2 }
 0x15e   : > { %v1682_v60 = vrot.slane %v1681_v63, 1 }
 0x15f   : > { %v1784_v0 = vadd.f32 %v1783_v59, %v1782_v61 }
 0x160   : > { %v1683_v1 = vadd.f32 %v1682_v60, %v1681_v63 }
 0x161   : > { %v1785_v2 = vrot.slane %v1784_v0, 1 }
 0x162   : > { %1685 = vst.msk [vmem:[%s473_s28] sm:$0x1] %vm1684_vm4, %v1683_v1 }
 0x163   : > { %v1786_v3 = vadd.f32 %v1785_v2, %v1784_v0 }
 0x165   : > { %1787 = vst.msk [vmem:[%s479_s8] sm:$0x1] %vm1684_vm4, %v1786_v3 }
 0x166 PF: > { %s18_s2 = sadd.s32 1, %s2462_s2   ;;  %s2861_s24 = smov %s2458_s1 }
 0x167   : > { %p15_p5 = scmp.ge.s32.totalorder %s18_s2, 4   ;;  %s2862_s1 = smov %s2864_s25 }
 0x169   :  { %17 = sbr.rel (!%p15_p5) target bundleno = 2 (0x2), region = 105 }

</bundles_post_ra>
